<compile_context>
chip_gen: v7x
topology: tpu7x:2x2x1
jax: 0.10.0
libtpu: 0.0.40
codegen_flags: <defaults>
</compile_context>

<pallas_src>
import numpy as np
import jax
import jax.numpy as jnp
from jax import lax
from jax.experimental import pallas as pl
from jax.experimental.pallas import tpu as pltpu

DIM_H = 32
DIM_PE = 8
DIM_HCROP = DIM_H - DIM_PE          # 24
NUM_HEADS = 4
HEAD_DIM = DIM_H // NUM_HEADS       # 8
BN_EPS = 1e-5

# ---------------------------------------------------------------------------
# Parameter slab layout: every weight/bias/BN tensor gets a fixed row range in a
# single (PARAM_SLAB_ROWS, 128) f32 table, so the kernel needs ONE weight DMA.
# ---------------------------------------------------------------------------
_PARAM_SHAPES = (
    ("wqkv", (DIM_H, 3 * DIM_H)),
    ("wo",   (DIM_H, DIM_H)),
    ("wO1",  (DIM_H, DIM_H)),
    ("wO2",  (DIM_H, DIM_HCROP)),
    ("wF1",  (DIM_HCROP, 2 * DIM_HCROP)),
    ("wF2",  (2 * DIM_HCROP, DIM_HCROP)),
    ("wlin", (DIM_H, DIM_PE)),
    ("wpe1", (DIM_PE, DIM_PE)),
    ("wpe2", (DIM_PE, DIM_PE)),
    ("bqkv", (1, 3 * DIM_H)),
    ("bo",   (1, DIM_H)),
    ("bO1",  (1, DIM_H)),
    ("bO2",  (1, DIM_HCROP)),
    ("bF1",  (1, 2 * DIM_HCROP)),
    ("bF2",  (1, DIM_HCROP)),
    ("blin", (1, DIM_PE)),
    ("bpe1", (1, DIM_PE)),
    ("bpe2", (1, DIM_PE)),
    ("bn1",  (2, DIM_HCROP)),
    ("bn2",  (2, DIM_HCROP)),
    ("bnpe", (2, DIM_PE)),
)
_PARAM_SHAPE = dict(_PARAM_SHAPES)
_PARAM_ROW = {}
_row = 0
for _name, _shape in _PARAM_SHAPES:
    _PARAM_ROW[_name] = _row
    _row += _shape[0]
PARAM_SLAB_ROWS = ((_row + 7) // 8) * 8      # 264
PARAM_SLAB_COLS = 128


def pack_params(params):
    """Pack all layer parameters into one (rows, 128) f32 slab.

    The attention scale 1/sqrt(head_dim) is folded into the Q columns of the packed
    in-projection weight and bias, so the kernel applies no explicit scaling.
    Called once (outside the per-step critical path).
    """
    scale = 1.0 / float(np.sqrt(HEAD_DIM))
    p = dict(params)
    p["wqkv"] = jnp.concatenate([p["wqkv"][:, :DIM_H] * scale, p["wqkv"][:, DIM_H:]], axis=1)
    p["bqkv"] = jnp.concatenate([p["bqkv"][:, :DIM_H] * scale, p["bqkv"][:, DIM_H:]], axis=1)

    slab = jnp.zeros((PARAM_SLAB_ROWS, PARAM_SLAB_COLS), jnp.float32)
    for name, (nr, nc) in _PARAM_SHAPES:
        val = jnp.asarray(p[name], jnp.float32)
        assert val.shape == (nr, nc), (name, val.shape, (nr, nc))
        r = _PARAM_ROW[name]
        slab = slab.at[r:r + nr, 0:nc].set(val)
    return slab


# ---------------------------------------------------------------------------
# In-kernel helpers
# ---------------------------------------------------------------------------
def _bn_train(x, gamma_beta):
    """BatchNorm1d, training-mode batch stats. gamma_beta: (2, C) = [gamma; beta].

    Two-pass centered variance (safer than E[x^2]-mean^2 against cancellation).
    """
    gamma = gamma_beta[0:1, :]
    beta = gamma_beta[1:2, :]
    inv_n = 1.0 / x.shape[0]
    mean = jnp.sum(x, axis=0, keepdims=True) * inv_n
    xc = x - mean
    var = jnp.sum(xc * xc, axis=0, keepdims=True) * inv_n
    return xc * lax.rsqrt(var + BN_EPS) * gamma + beta


# ---------------------------------------------------------------------------
# Fused layer kernel: block-diagonal MHA + node MLP/BN path + GINE PE path.
# Grid-less: the whole (N, 32) node table lives in VMEM for one invocation.
# ---------------------------------------------------------------------------
def gps_layer_kernel(x_ref, bcol_ref, brow_ref, src_ref, dst_ref, ea_ref, ws_ref,
                     o_ref, xsrc_ref):
    f32 = jnp.float32
    N = x_ref.shape[0]
    E = ea_ref.shape[0]

    def w(name):
        """Static slice of the packed parameter slab (zero-cost ref view -> load)."""
        r = _PARAM_ROW[name]
        nr, nc = _PARAM_SHAPE[name]
        return ws_ref[r:r + nr, 0:nc]

    x = x_ref[...]                     # (N, dim_h)
    h_in1 = x[:, :DIM_HCROP]           # (N, 24)
    pe_in = x[:, DIM_HCROP:]           # (N, 8)

    # ---------- global attention: block-diagonal multi-head self-attention ----------
    # Equivalent to to_dense_batch + MultiheadAttention(key_padding_mask) + [mask].
    # Q is already pre-scaled (scale folded into wqkv/bqkv at pack time).
    qkv = jnp.dot(x, w("wqkv"), preferred_element_type=f32) + w("bqkv")      # (N, 3*dim_h)
    neg = jnp.where(bcol_ref[...] == brow_ref[...], 0.0, -1e30)              # (N, N) additive mask

    hv_parts = []
    for hh in range(NUM_HEADS):        # unrolled over 4 heads (tiny N); TODO(synk): fori/flash for large N
        lo = hh * HEAD_DIM
        hi = lo + HEAD_DIM
        qh = qkv[:, lo:hi]
        kh = qkv[:, DIM_H + lo:DIM_H + hi]
        vh = qkv[:, 2 * DIM_H + lo:2 * DIM_H + hi]
        # scores = qh @ kh^T (contract last dims; no transpose op)
        s = lax.dot_general(qh, kh, (((1,), (1,)), ((), ())),
                            preferred_element_type=f32) + neg
        s = s - jnp.max(s, axis=-1, keepdims=True)
        p = jnp.exp(s)
        p = p * pl.reciprocal(jnp.sum(p, axis=-1, keepdims=True), approx=False)
        hv_parts.append(jnp.dot(p, vh, preferred_element_type=f32))          # (N, head_dim)
    hv = jnp.concatenate(hv_parts, axis=-1)                                  # (N, dim_h), lanes 0..31
    h_attn = jnp.dot(hv, w("wo"), preferred_element_type=f32) + w("bo")      # one K=32 out-projection

    # ---------- node path: O_h MLP + residual + BN1 + FFN + residual + BN2 ----------
    h = jnp.maximum(jnp.dot(h_attn, w("wO1"), preferred_element_type=f32) + w("bO1"), 0.0)
    h = jnp.dot(h, w("wO2"), preferred_element_type=f32) + w("bO2")
    h = _bn_train(h_in1 + h, w("bn1"))                                       # residual 1 + BN1
    h_in2 = h
    h = jnp.maximum(jnp.dot(h, w("wF1"), preferred_element_type=f32) + w("bF1"), 0.0)
    h = jnp.dot(h, w("wF2"), preferred_element_type=f32) + w("bF2")
    h = _bn_train(h_in2 + h, w("bn2"))                                       # residual 2 + BN2

    # ---------- PE path: GINEConv(pe_in) + ReLU + BN + residual ----------
    # Row gather pe_in[src[e]] via SMEM indices (O(E)), replacing the O(E*N) one-hot.
    def gather_body(e, carry):
        row = x_ref[pl.ds(src_ref[e], 1), :]                                 # (1, dim_h), dyn sublane
        xsrc_ref[pl.ds(e, 1), :] = row[:, DIM_HCROP:]                        # keep PE lanes only
        return carry
    lax.fori_loop(0, E, gather_body, 0)
    x_src = xsrc_ref[...]                                                    # (E, dim_pe)

    elin = jnp.dot(ea_ref[...], w("wlin"), preferred_element_type=f32) + w("blin")
    msg = jnp.maximum(x_src + elin, 0.0)                                     # relu(x_j + lin(e_ji))
    # Scatter-add over incoming edges via in-kernel one-hot matmul (clean MXU scatter).
    scat = jnp.where(lax.broadcasted_iota(jnp.int32, (N, E), 0) == dst_ref[...], 1.0, 0.0)
    aggr = jnp.dot(scat, msg, preferred_element_type=f32)                    # (N, dim_pe)

    out = pe_in + aggr                                                       # (1+eps)*x, eps=0
    out = jnp.maximum(jnp.dot(out, w("wpe1"), preferred_element_type=f32) + w("bpe1"), 0.0)
    out = jnp.dot(out, w("wpe2"), preferred_element_type=f32) + w("bpe2")
    pe = pe_in + _bn_train(jnp.maximum(out, 0.0), w("bnpe"))                 # F.relu + BN + residual

    # ---------- batch.x = cat((h, pe), 1): one lane-dense (N, 32) store ----------
    o_ref[...] = jnp.concatenate([h, pe], axis=-1)


def _vmem_spec():
    return pl.BlockSpec(memory_space=pltpu.MemorySpace.VMEM)


def _smem_spec():
    return pl.BlockSpec(memory_space=pltpu.MemorySpace.SMEM)


@jax.jit
def gps_wlpe_forward(x, edge_index, batch_vec, edge_attr, wslab):
    """Full GPSwLPELayer forward. x: (N, dim_h), edge_index: (2, E) [src; dst],
    batch_vec: (N,) graph id, edge_attr: (E, dim_h), wslab: packed parameter slab."""
    N = x.shape[0]
    E = edge_index.shape[1]
    bcol = batch_vec.astype(jnp.int32).reshape(N, 1)
    brow = batch_vec.astype(jnp.int32).reshape(1, N)
    src = edge_index[0].astype(jnp.int32)                 # (E,) -> SMEM (gather indices)
    dst_row = edge_index[1].astype(jnp.int32).reshape(1, E)

    return pl.pallas_call(
        gps_layer_kernel,
        out_shape=jax.ShapeDtypeStruct((N, DIM_H), jnp.float32),
        in_specs=[_vmem_spec(),   # x
                  _vmem_spec(),   # bcol
                  _vmem_spec(),   # brow
                  _smem_spec(),   # src (scalar gather indices)
                  _vmem_spec(),   # dst (row vector for scatter one-hot)
                  _vmem_spec(),   # edge_attr
                  _vmem_spec()],  # packed parameter slab (single DMA)
        out_specs=_vmem_spec(),
        scratch_shapes=[pltpu.VMEM((E, DIM_PE), jnp.float32)],   # gathered pe_in[src]
        # TODO(synk): size vmem_limit_bytes from N/E once graphs reach ~1-2k nodes/edges.
        compiler_params=pltpu.CompilerParams(vmem_limit_bytes=32 * 1024 * 1024),
    )(x, bcol, brow, src, dst_row, edge_attr, wslab)


# ---------------------------------------------------------------------------
# Parameters (deterministic synthetic init, shapes from __init__)
# ---------------------------------------------------------------------------
def init_params(key):
    ks = jax.random.split(key, 9)

    def lin(k, din, dout, scale=0.1):
        kw, kb = jax.random.split(k)
        return (scale * jax.random.normal(kw, (din, dout), jnp.float32),
                scale * jax.random.normal(kb, (1, dout), jnp.float32))

    p = {}
    # MultiheadAttention (packed in_proj for q,k,v; out_proj)
    p["wqkv"], p["bqkv"] = lin(ks[0], DIM_H, 3 * DIM_H)
    p["wo"], p["bo"] = lin(ks[1], DIM_H, DIM_H)
    # O_h: Linear(dim_h, dim_h) -> ReLU -> Linear(dim_h, dim_hcrop)
    p["wO1"], p["bO1"] = lin(ks[2], DIM_H, DIM_H)
    p["wO2"], p["bO2"] = lin(ks[3], DIM_H, DIM_HCROP)
    # FFN
    p["wF1"], p["bF1"] = lin(ks[4], DIM_HCROP, 2 * DIM_HCROP)
    p["wF2"], p["bF2"] = lin(ks[5], 2 * DIM_HCROP, DIM_HCROP)
    # GINEConv: edge lin (dim_h -> dim_pe) and gin_nn
    p["wlin"], p["blin"] = lin(ks[6], DIM_H, DIM_PE)
    p["wpe1"], p["bpe1"] = lin(ks[7], DIM_PE, DIM_PE)
    p["wpe2"], p["bpe2"] = lin(ks[8], DIM_PE, DIM_PE)
    # BatchNorm affine (torch default: gamma=1, beta=0), rows [gamma, beta]
    p["bn1"] = jnp.stack([jnp.ones((DIM_HCROP,)), jnp.zeros((DIM_HCROP,))]).astype(jnp.float32)
    p["bn2"] = jnp.stack([jnp.ones((DIM_HCROP,)), jnp.zeros((DIM_HCROP,))]).astype(jnp.float32)
    p["bnpe"] = jnp.stack([jnp.ones((DIM_PE,)), jnp.zeros((DIM_PE,))]).astype(jnp.float32)
    return p


# ---------------------------------------------------------------------------
# Pure-JAX reference (mirrors the PyTorch forward) for a sanity check
# ---------------------------------------------------------------------------
def reference_forward(x, edge_index, batch_vec, edge_attr, p):
    N = x.shape[0]
    h_in1 = x[:, :DIM_HCROP]
    pe_in = x[:, DIM_HCROP:]

    def bn(v, gb):
        m = v.mean(0, keepdims=True)
        var = v.var(0, keepdims=True)
        return (v - m) / jnp.sqrt(var + BN_EPS) * gb[0:1] + gb[1:2]

    qkv = x @ p["wqkv"] + p["bqkv"]
    q, k, v = qkv[:, :DIM_H], qkv[:, DIM_H:2 * DIM_H], qkv[:, 2 * DIM_H:]
    same = batch_vec[:, None] == batch_vec[None, :]
    heads = []
    for h in range(NUM_HEADS):
        sl = slice(h * HEAD_DIM, (h + 1) * HEAD_DIM)
        s = (q[:, sl] @ k[:, sl].T) / np.sqrt(HEAD_DIM)
        s = jnp.where(same, s, -jnp.inf)
        heads.append(jax.nn.softmax(s, axis=-1) @ v[:, sl])
    h_attn = jnp.concatenate(heads, axis=-1) @ p["wo"] + p["bo"]

    h = jnp.maximum(h_attn @ p["wO1"] + p["bO1"], 0.0) @ p["wO2"] + p["bO2"]
    h = bn(h_in1 + h, p["bn1"])
    h2 = jnp.maximum(h @ p["wF1"] + p["bF1"], 0.0) @ p["wF2"] + p["bF2"]
    h = bn(h + h2, p["bn2"])

    src, dst = edge_index[0], edge_index[1]
    elin = edge_attr @ p["wlin"] + p["blin"]
    msg = jnp.maximum(pe_in[src] + elin, 0.0)
    aggr = jnp.zeros((N, DIM_PE), jnp.float32).at[dst].add(msg)
    out = pe_in + aggr
    out = jnp.maximum(out @ p["wpe1"] + p["bpe1"], 0.0) @ p["wpe2"] + p["bpe2"]
    pe = pe_in + bn(jnp.maximum(out, 0.0), p["bnpe"])
    return jnp.concatenate([h, pe], axis=1)


if __name__ == "__main__":
    key = jax.random.PRNGKey(0)
    kx, kea, kp = jax.random.split(key, 3)

    # Two graphs in the batch: 8 nodes and 4 nodes -> N=12.
    batch_vec = jnp.asarray(np.array([0] * 8 + [1] * 4, dtype=np.int32))
    N = batch_vec.shape[0]

    # Bidirectional ring edges inside each graph.
    edges = []
    for i in range(8):
        j = (i + 1) % 8
        edges.append((i, j)); edges.append((j, i))
    for i in range(4):
        j = (i + 1) % 4
        edges.append((8 + i, 8 + j)); edges.append((8 + j, 8 + i))
    edge_index = jnp.asarray(np.array(edges, dtype=np.int32).T)   # (2, E)
    E = edge_index.shape[1]

    x = jax.random.normal(kx, (N, DIM_H), jnp.float32)             # batch.x
    edge_attr = jax.random.normal(kea, (E, DIM_H), jnp.float32)    # batch.edge_attr
    params = init_params(kp)
    wslab = pack_params(params)   # packed once; per-call the weights are 1 contiguous DMA

    out = gps_wlpe_forward(x, edge_index, batch_vec, edge_attr, wslab)
    out = jax.block_until_ready(out)

    assert out.shape == (N, DIM_H), out.shape
    assert np.isfinite(np.asarray(out)).all()

    ref = reference_forward(x, edge_index, batch_vec, edge_attr, params)
    err = float(jnp.max(jnp.abs(out - ref)))
    assert err < 1e-3, f"kernel/reference mismatch: max abs err = {err}"

    print("KERNEL_OK")
</pallas_src>

<mosaic_0001>
module attributes {stable_mosaic.version = 11 : i64} {
  func.func @gps_layer_kernel(%arg0: memref<12x32xf32, #tpu.memory_space<vmem>>, %arg1: memref<12x1xi32, #tpu.memory_space<vmem>>, %arg2: memref<1x12xi32, #tpu.memory_space<vmem>>, %arg3: memref<24xi32, #tpu.memory_space<smem>>, %arg4: memref<1x24xi32, #tpu.memory_space<vmem>>, %arg5: memref<24x32xf32, #tpu.memory_space<vmem>>, %arg6: memref<264x128xf32, #tpu.memory_space<vmem>>, %arg7: memref<12x32xf32, #tpu.memory_space<vmem>>, %arg8: memref<24x8xf32, #tpu.memory_space<vmem>>) attributes {dimension_semantics = [], scalar_prefetch = 0 : i64, scratch_operands = 1 : i64, tpu.core_type = #tpu.core_type<tc>} {
    %c0 = arith.constant 0 : index
    %c0_0 = arith.constant 0 : index
    %0 = vector.load %arg0[%c0, %c0_0] : memref<12x32xf32, #tpu.memory_space<vmem>>, vector<12x32xf32>
    %1 = vector.extract_strided_slice %0 {offsets = [0, 0], sizes = [12, 24], strides = [1, 1]} : vector<12x32xf32> to vector<12x24xf32>
    %2 = vector.extract_strided_slice %0 {offsets = [0, 24], sizes = [12, 8], strides = [1, 1]} : vector<12x32xf32> to vector<12x8xf32>
    %c0_1 = arith.constant 0 : index
    %c0_2 = arith.constant 0 : index
    %3 = vector.load %arg6[%c0_1, %c0_2] : memref<264x128xf32, #tpu.memory_space<vmem>>, vector<32x96xf32>
    %cst = arith.constant dense<0.000000e+00> : vector<12x96xf32>
    %4 = tpu.matmul %0, %3, %cst {dimension_numbers = #tpu.dot_dimension_numbers<[1], [0], [0], [1], [0, 0, 1, 1], [], []>} : vector<12x32xf32>, vector<32x96xf32>, vector<12x96xf32> -> vector<12x96xf32>
    %c248 = arith.constant 248 : index
    %c0_3 = arith.constant 0 : index
    %5 = vector.load %arg6[%c248, %c0_3] : memref<264x128xf32, #tpu.memory_space<vmem>>, vector<1x96xf32>
    %6 = vector.broadcast %5 : vector<1x96xf32> to vector<12x96xf32>
    %7 = arith.addf %4, %6 : vector<12x96xf32>
    %c0_4 = arith.constant 0 : index
    %c0_5 = arith.constant 0 : index
    %8 = vector.load %arg1[%c0_4, %c0_5] : memref<12x1xi32, #tpu.memory_space<vmem>>, vector<12x1xi32>
    %c0_6 = arith.constant 0 : index
    %c0_7 = arith.constant 0 : index
    %9 = vector.load %arg2[%c0_6, %c0_7] : memref<1x12xi32, #tpu.memory_space<vmem>>, vector<1x12xi32>
    %10 = vector.broadcast %8 : vector<12x1xi32> to vector<12x12xi32>
    %11 = vector.broadcast %9 : vector<1x12xi32> to vector<12x12xi32>
    %12 = arith.cmpi eq, %10, %11 : vector<12x12xi32>
    %cst_8 = arith.constant 0.000000e+00 : f32
    %cst_9 = arith.constant -1.000000e+30 : f32
    %13 = vector.broadcast %cst_8 : f32 to vector<12x12xf32>
    %14 = vector.broadcast %cst_9 : f32 to vector<12x12xf32>
    %15 = arith.select %12, %13, %14 : vector<12x12xi1>, vector<12x12xf32>
    %16 = vector.extract_strided_slice %7 {offsets = [0, 0], sizes = [12, 8], strides = [1, 1]} : vector<12x96xf32> to vector<12x8xf32>
    %17 = vector.extract_strided_slice %7 {offsets = [0, 32], sizes = [12, 8], strides = [1, 1]} : vector<12x96xf32> to vector<12x8xf32>
    %18 = vector.extract_strided_slice %7 {offsets = [0, 64], sizes = [12, 8], strides = [1, 1]} : vector<12x96xf32> to vector<12x8xf32>
    %cst_10 = arith.constant dense<0.000000e+00> : vector<12x12xf32>
    %19 = tpu.matmul %16, %17, %cst_10 {dimension_numbers = #tpu.dot_dimension_numbers<[1], [1], [0], [0], [0, 0, 1, 0], [], []>} : vector<12x8xf32>, vector<12x8xf32>, vector<12x12xf32> -> vector<12x12xf32>
    %20 = arith.addf %19, %15 : vector<12x12xf32>
    %cst_11 = arith.constant dense<0xFF800000> : vector<12xf32>
    %21 = vector.multi_reduction <maximumf>, %20, %cst_11 [1] : vector<12x12xf32> to vector<12xf32>
    %22 = vector.shape_cast %21 : vector<12xf32> to vector<12x1xf32>
    %23 = vector.broadcast %22 : vector<12x1xf32> to vector<12x12xf32>
    %24 = arith.subf %20, %23 : vector<12x12xf32>
    %25 = math.exp %24 : vector<12x12xf32>
    %cst_12 = arith.constant dense<0.000000e+00> : vector<12xf32>
    %26 = vector.multi_reduction <add>, %25, %cst_12 [1] : vector<12x12xf32> to vector<12xf32>
    %27 = vector.shape_cast %26 : vector<12xf32> to vector<12x1xf32>
    %28 = tpu.reciprocal %27 : vector<12x1xf32> -> vector<12x1xf32>
    %29 = vector.broadcast %28 : vector<12x1xf32> to vector<12x12xf32>
    %30 = arith.mulf %25, %29 : vector<12x12xf32>
    %cst_13 = arith.constant dense<0.000000e+00> : vector<12x8xf32>
    %31 = tpu.matmul %30, %18, %cst_13 {dimension_numbers = #tpu.dot_dimension_numbers<[1], [0], [0], [1], [0, 0, 1, 1], [], []>} : vector<12x12xf32>, vector<12x8xf32>, vector<12x8xf32> -> vector<12x8xf32>
    %32 = vector.extract_strided_slice %7 {offsets = [0, 8], sizes = [12, 8], strides = [1, 1]} : vector<12x96xf32> to vector<12x8xf32>
    %33 = vector.extract_strided_slice %7 {offsets = [0, 40], sizes = [12, 8], strides = [1, 1]} : vector<12x96xf32> to vector<12x8xf32>
    %34 = vector.extract_strided_slice %7 {offsets = [0, 72], sizes = [12, 8], strides = [1, 1]} : vector<12x96xf32> to vector<12x8xf32>
    %cst_14 = arith.constant dense<0.000000e+00> : vector<12x12xf32>
    %35 = tpu.matmul %32, %33, %cst_14 {dimension_numbers = #tpu.dot_dimension_numbers<[1], [1], [0], [0], [0, 0, 1, 0], [], []>} : vector<12x8xf32>, vector<12x8xf32>, vector<12x12xf32> -> vector<12x12xf32>
    %36 = arith.addf %35, %15 : vector<12x12xf32>
    %cst_15 = arith.constant dense<0xFF800000> : vector<12xf32>
    %37 = vector.multi_reduction <maximumf>, %36, %cst_15 [1] : vector<12x12xf32> to vector<12xf32>
    %38 = vector.shape_cast %37 : vector<12xf32> to vector<12x1xf32>
    %39 = vector.broadcast %38 : vector<12x1xf32> to vector<12x12xf32>
    %40 = arith.subf %36, %39 : vector<12x12xf32>
    %41 = math.exp %40 : vector<12x12xf32>
    %cst_16 = arith.constant dense<0.000000e+00> : vector<12xf32>
    %42 = vector.multi_reduction <add>, %41, %cst_16 [1] : vector<12x12xf32> to vector<12xf32>
    %43 = vector.shape_cast %42 : vector<12xf32> to vector<12x1xf32>
    %44 = tpu.reciprocal %43 : vector<12x1xf32> -> vector<12x1xf32>
    %45 = vector.broadcast %44 : vector<12x1xf32> to vector<12x12xf32>
    %46 = arith.mulf %41, %45 : vector<12x12xf32>
    %cst_17 = arith.constant dense<0.000000e+00> : vector<12x8xf32>
    %47 = tpu.matmul %46, %34, %cst_17 {dimension_numbers = #tpu.dot_dimension_numbers<[1], [0], [0], [1], [0, 0, 1, 1], [], []>} : vector<12x12xf32>, vector<12x8xf32>, vector<12x8xf32> -> vector<12x8xf32>
    %48 = vector.extract_strided_slice %7 {offsets = [0, 16], sizes = [12, 8], strides = [1, 1]} : vector<12x96xf32> to vector<12x8xf32>
    %49 = vector.extract_strided_slice %7 {offsets = [0, 48], sizes = [12, 8], strides = [1, 1]} : vector<12x96xf32> to vector<12x8xf32>
    %50 = vector.extract_strided_slice %7 {offsets = [0, 80], sizes = [12, 8], strides = [1, 1]} : vector<12x96xf32> to vector<12x8xf32>
    %cst_18 = arith.constant dense<0.000000e+00> : vector<12x12xf32>
    %51 = tpu.matmul %48, %49, %cst_18 {dimension_numbers = #tpu.dot_dimension_numbers<[1], [1], [0], [0], [0, 0, 1, 0], [], []>} : vector<12x8xf32>, vector<12x8xf32>, vector<12x12xf32> -> vector<12x12xf32>
    %52 = arith.addf %51, %15 : vector<12x12xf32>
    %cst_19 = arith.constant dense<0xFF800000> : vector<12xf32>
    %53 = vector.multi_reduction <maximumf>, %52, %cst_19 [1] : vector<12x12xf32> to vector<12xf32>
    %54 = vector.shape_cast %53 : vector<12xf32> to vector<12x1xf32>
    %55 = vector.broadcast %54 : vector<12x1xf32> to vector<12x12xf32>
    %56 = arith.subf %52, %55 : vector<12x12xf32>
    %57 = math.exp %56 : vector<12x12xf32>
    %cst_20 = arith.constant dense<0.000000e+00> : vector<12xf32>
    %58 = vector.multi_reduction <add>, %57, %cst_20 [1] : vector<12x12xf32> to vector<12xf32>
    %59 = vector.shape_cast %58 : vector<12xf32> to vector<12x1xf32>
    %60 = tpu.reciprocal %59 : vector<12x1xf32> -> vector<12x1xf32>
    %61 = vector.broadcast %60 : vector<12x1xf32> to vector<12x12xf32>
    %62 = arith.mulf %57, %61 : vector<12x12xf32>
    %cst_21 = arith.constant dense<0.000000e+00> : vector<12x8xf32>
    %63 = tpu.matmul %62, %50, %cst_21 {dimension_numbers = #tpu.dot_dimension_numbers<[1], [0], [0], [1], [0, 0, 1, 1], [], []>} : vector<12x12xf32>, vector<12x8xf32>, vector<12x8xf32> -> vector<12x8xf32>
    %64 = vector.extract_strided_slice %7 {offsets = [0, 24], sizes = [12, 8], strides = [1, 1]} : vector<12x96xf32> to vector<12x8xf32>
    %65 = vector.extract_strided_slice %7 {offsets = [0, 56], sizes = [12, 8], strides = [1, 1]} : vector<12x96xf32> to vector<12x8xf32>
    %66 = vector.extract_strided_slice %7 {offsets = [0, 88], sizes = [12, 8], strides = [1, 1]} : vector<12x96xf32> to vector<12x8xf32>
    %cst_22 = arith.constant dense<0.000000e+00> : vector<12x12xf32>
    %67 = tpu.matmul %64, %65, %cst_22 {dimension_numbers = #tpu.dot_dimension_numbers<[1], [1], [0], [0], [0, 0, 1, 0], [], []>} : vector<12x8xf32>, vector<12x8xf32>, vector<12x12xf32> -> vector<12x12xf32>
    %68 = arith.addf %67, %15 : vector<12x12xf32>
    %cst_23 = arith.constant dense<0xFF800000> : vector<12xf32>
    %69 = vector.multi_reduction <maximumf>, %68, %cst_23 [1] : vector<12x12xf32> to vector<12xf32>
    %70 = vector.shape_cast %69 : vector<12xf32> to vector<12x1xf32>
    %71 = vector.broadcast %70 : vector<12x1xf32> to vector<12x12xf32>
    %72 = arith.subf %68, %71 : vector<12x12xf32>
    %73 = math.exp %72 : vector<12x12xf32>
    %cst_24 = arith.constant dense<0.000000e+00> : vector<12xf32>
    %74 = vector.multi_reduction <add>, %73, %cst_24 [1] : vector<12x12xf32> to vector<12xf32>
    %75 = vector.shape_cast %74 : vector<12xf32> to vector<12x1xf32>
    %76 = tpu.reciprocal %75 : vector<12x1xf32> -> vector<12x1xf32>
    %77 = vector.broadcast %76 : vector<12x1xf32> to vector<12x12xf32>
    %78 = arith.mulf %73, %77 : vector<12x12xf32>
    %cst_25 = arith.constant dense<0.000000e+00> : vector<12x8xf32>
    %79 = tpu.matmul %78, %66, %cst_25 {dimension_numbers = #tpu.dot_dimension_numbers<[1], [0], [0], [1], [0, 0, 1, 1], [], []>} : vector<12x12xf32>, vector<12x8xf32>, vector<12x8xf32> -> vector<12x8xf32>
    %80 = tpu.concatenate %31, %47, %63, %79 in 1 : vector<12x8xf32>, vector<12x8xf32>, vector<12x8xf32>, vector<12x8xf32> -> vector<12x32xf32>
    %c32 = arith.constant 32 : index
    %c0_26 = arith.constant 0 : index
    %81 = vector.load %arg6[%c32, %c0_26] : memref<264x128xf32, #tpu.memory_space<vmem>>, vector<32x32xf32>
    %cst_27 = arith.constant dense<0.000000e+00> : vector<12x32xf32>
    %82 = tpu.matmul %80, %81, %cst_27 {dimension_numbers = #tpu.dot_dimension_numbers<[1], [0], [0], [1], [0, 0, 1, 1], [], []>} : vector<12x32xf32>, vector<32x32xf32>, vector<12x32xf32> -> vector<12x32xf32>
    %c249 = arith.constant 249 : index
    %c0_28 = arith.constant 0 : index
    %83 = vector.load %arg6[%c249, %c0_28] : memref<264x128xf32, #tpu.memory_space<vmem>>, vector<1x32xf32>
    %84 = vector.broadcast %83 : vector<1x32xf32> to vector<12x32xf32>
    %85 = arith.addf %82, %84 : vector<12x32xf32>
    %c64 = arith.constant 64 : index
    %c0_29 = arith.constant 0 : index
    %86 = vector.load %arg6[%c64, %c0_29] : memref<264x128xf32, #tpu.memory_space<vmem>>, vector<32x32xf32>
    %cst_30 = arith.constant dense<0.000000e+00> : vector<12x32xf32>
    %87 = tpu.matmul %85, %86, %cst_30 {dimension_numbers = #tpu.dot_dimension_numbers<[1], [0], [0], [1], [0, 0, 1, 1], [], []>} : vector<12x32xf32>, vector<32x32xf32>, vector<12x32xf32> -> vector<12x32xf32>
    %c250 = arith.constant 250 : index
    %c0_31 = arith.constant 0 : index
    %88 = vector.load %arg6[%c250, %c0_31] : memref<264x128xf32, #tpu.memory_space<vmem>>, vector<1x32xf32>
    %89 = vector.broadcast %88 : vector<1x32xf32> to vector<12x32xf32>
    %90 = arith.addf %87, %89 : vector<12x32xf32>
    %cst_32 = arith.constant 0.000000e+00 : f32
    %91 = vector.broadcast %cst_32 : f32 to vector<12x32xf32>
    %92 = arith.maximumf %90, %91 : vector<12x32xf32>
    %c96 = arith.constant 96 : index
    %c0_33 = arith.constant 0 : index
    %93 = vector.load %arg6[%c96, %c0_33] : memref<264x128xf32, #tpu.memory_space<vmem>>, vector<32x24xf32>
    %cst_34 = arith.constant dense<0.000000e+00> : vector<12x24xf32>
    %94 = tpu.matmul %92, %93, %cst_34 {dimension_numbers = #tpu.dot_dimension_numbers<[1], [0], [0], [1], [0, 0, 1, 1], [], []>} : vector<12x32xf32>, vector<32x24xf32>, vector<12x24xf32> -> vector<12x24xf32>
    %c251 = arith.constant 251 : index
    %c0_35 = arith.constant 0 : index
    %95 = vector.load %arg6[%c251, %c0_35] : memref<264x128xf32, #tpu.memory_space<vmem>>, vector<1x24xf32>
    %96 = vector.broadcast %95 : vector<1x24xf32> to vector<12x24xf32>
    %97 = arith.addf %94, %96 : vector<12x24xf32>
    %98 = arith.addf %1, %97 : vector<12x24xf32>
    %c257 = arith.constant 257 : index
    %c0_36 = arith.constant 0 : index
    %99 = vector.load %arg6[%c257, %c0_36] : memref<264x128xf32, #tpu.memory_space<vmem>>, vector<2x24xf32>
    %100 = vector.extract_strided_slice %99 {offsets = [0, 0], sizes = [1, 24], strides = [1, 1]} : vector<2x24xf32> to vector<1x24xf32>
    %101 = vector.extract_strided_slice %99 {offsets = [1, 0], sizes = [1, 24], strides = [1, 1]} : vector<2x24xf32> to vector<1x24xf32>
    %cst_37 = arith.constant dense<0.000000e+00> : vector<24xf32>
    %102 = vector.multi_reduction <add>, %98, %cst_37 [0] : vector<12x24xf32> to vector<24xf32>
    %103 = vector.shape_cast %102 : vector<24xf32> to vector<1x24xf32>
    %cst_38 = arith.constant 0.0833333358 : f32
    %104 = vector.broadcast %cst_38 : f32 to vector<1x24xf32>
    %105 = arith.mulf %103, %104 : vector<1x24xf32>
    %106 = vector.broadcast %105 : vector<1x24xf32> to vector<12x24xf32>
    %107 = arith.subf %98, %106 : vector<12x24xf32>
    %108 = arith.mulf %107, %107 : vector<12x24xf32>
    %cst_39 = arith.constant dense<0.000000e+00> : vector<24xf32>
    %109 = vector.multi_reduction <add>, %108, %cst_39 [0] : vector<12x24xf32> to vector<24xf32>
    %110 = vector.shape_cast %109 : vector<24xf32> to vector<1x24xf32>
    %cst_40 = arith.constant 0.0833333358 : f32
    %111 = vector.broadcast %cst_40 : f32 to vector<1x24xf32>
    %112 = arith.mulf %110, %111 : vector<1x24xf32>
    %cst_41 = arith.constant 9.99999974E-6 : f32
    %113 = vector.broadcast %cst_41 : f32 to vector<1x24xf32>
    %114 = arith.addf %112, %113 : vector<1x24xf32>
    %115 = math.rsqrt %114 : vector<1x24xf32>
    %116 = vector.broadcast %115 : vector<1x24xf32> to vector<12x24xf32>
    %117 = arith.mulf %107, %116 : vector<12x24xf32>
    %118 = vector.broadcast %100 : vector<1x24xf32> to vector<12x24xf32>
    %119 = arith.mulf %117, %118 : vector<12x24xf32>
    %120 = vector.broadcast %101 : vector<1x24xf32> to vector<12x24xf32>
    %121 = arith.addf %119, %120 : vector<12x24xf32>
    %c128 = arith.constant 128 : index
    %c0_42 = arith.constant 0 : index
    %122 = vector.load %arg6[%c128, %c0_42] : memref<264x128xf32, #tpu.memory_space<vmem>>, vector<24x48xf32>
    %cst_43 = arith.constant dense<0.000000e+00> : vector<12x48xf32>
    %123 = tpu.matmul %121, %122, %cst_43 {dimension_numbers = #tpu.dot_dimension_numbers<[1], [0], [0], [1], [0, 0, 1, 1], [], []>} : vector<12x24xf32>, vector<24x48xf32>, vector<12x48xf32> -> vector<12x48xf32>
    %c252 = arith.constant 252 : index
    %c0_44 = arith.constant 0 : index
    %124 = vector.load %arg6[%c252, %c0_44] : memref<264x128xf32, #tpu.memory_space<vmem>>, vector<1x48xf32>
    %125 = vector.broadcast %124 : vector<1x48xf32> to vector<12x48xf32>
    %126 = arith.addf %123, %125 : vector<12x48xf32>
    %cst_45 = arith.constant 0.000000e+00 : f32
    %127 = vector.broadcast %cst_45 : f32 to vector<12x48xf32>
    %128 = arith.maximumf %126, %127 : vector<12x48xf32>
    %c152 = arith.constant 152 : index
    %c0_46 = arith.constant 0 : index
    %129 = vector.load %arg6[%c152, %c0_46] : memref<264x128xf32, #tpu.memory_space<vmem>>, vector<48x24xf32>
    %cst_47 = arith.constant dense<0.000000e+00> : vector<12x24xf32>
    %130 = tpu.matmul %128, %129, %cst_47 {dimension_numbers = #tpu.dot_dimension_numbers<[1], [0], [0], [1], [0, 0, 1, 1], [], []>} : vector<12x48xf32>, vector<48x24xf32>, vector<12x24xf32> -> vector<12x24xf32>
    %c253 = arith.constant 253 : index
    %c0_48 = arith.constant 0 : index
    %131 = vector.load %arg6[%c253, %c0_48] : memref<264x128xf32, #tpu.memory_space<vmem>>, vector<1x24xf32>
    %132 = vector.broadcast %131 : vector<1x24xf32> to vector<12x24xf32>
    %133 = arith.addf %130, %132 : vector<12x24xf32>
    %134 = arith.addf %121, %133 : vector<12x24xf32>
    %c259 = arith.constant 259 : index
    %c0_49 = arith.constant 0 : index
    %135 = vector.load %arg6[%c259, %c0_49] : memref<264x128xf32, #tpu.memory_space<vmem>>, vector<2x24xf32>
    %136 = vector.extract_strided_slice %135 {offsets = [0, 0], sizes = [1, 24], strides = [1, 1]} : vector<2x24xf32> to vector<1x24xf32>
    %137 = vector.extract_strided_slice %135 {offsets = [1, 0], sizes = [1, 24], strides = [1, 1]} : vector<2x24xf32> to vector<1x24xf32>
    %cst_50 = arith.constant dense<0.000000e+00> : vector<24xf32>
    %138 = vector.multi_reduction <add>, %134, %cst_50 [0] : vector<12x24xf32> to vector<24xf32>
    %139 = vector.shape_cast %138 : vector<24xf32> to vector<1x24xf32>
    %cst_51 = arith.constant 0.0833333358 : f32
    %140 = vector.broadcast %cst_51 : f32 to vector<1x24xf32>
    %141 = arith.mulf %139, %140 : vector<1x24xf32>
    %142 = vector.broadcast %141 : vector<1x24xf32> to vector<12x24xf32>
    %143 = arith.subf %134, %142 : vector<12x24xf32>
    %144 = arith.mulf %143, %143 : vector<12x24xf32>
    %cst_52 = arith.constant dense<0.000000e+00> : vector<24xf32>
    %145 = vector.multi_reduction <add>, %144, %cst_52 [0] : vector<12x24xf32> to vector<24xf32>
    %146 = vector.shape_cast %145 : vector<24xf32> to vector<1x24xf32>
    %cst_53 = arith.constant 0.0833333358 : f32
    %147 = vector.broadcast %cst_53 : f32 to vector<1x24xf32>
    %148 = arith.mulf %146, %147 : vector<1x24xf32>
    %cst_54 = arith.constant 9.99999974E-6 : f32
    %149 = vector.broadcast %cst_54 : f32 to vector<1x24xf32>
    %150 = arith.addf %148, %149 : vector<1x24xf32>
    %151 = math.rsqrt %150 : vector<1x24xf32>
    %152 = vector.broadcast %151 : vector<1x24xf32> to vector<12x24xf32>
    %153 = arith.mulf %143, %152 : vector<12x24xf32>
    %154 = vector.broadcast %136 : vector<1x24xf32> to vector<12x24xf32>
    %155 = arith.mulf %153, %154 : vector<12x24xf32>
    %156 = vector.broadcast %137 : vector<1x24xf32> to vector<12x24xf32>
    %157 = arith.addf %155, %156 : vector<12x24xf32>
    %c0_i32 = arith.constant 0 : i32
    %c24_i32 = arith.constant 24 : i32
    %158 = arith.addi %c0_i32, %c24_i32 : i32
    %c1_i32 = arith.constant 1 : i32
    scf.for %arg9 = %c0_i32 to %158 step %c1_i32  : i32 {
      %218 = arith.index_cast %arg9 : i32 to index
      %219 = memref.load %arg3[%218] : memref<24xi32, #tpu.memory_space<smem>>
      %220 = arith.index_cast %219 : i32 to index
      %c0_85 = arith.constant 0 : index
      %221 = vector.load %arg0[%220, %c0_85] : memref<12x32xf32, #tpu.memory_space<vmem>>, vector<1x32xf32>
      %222 = vector.extract_strided_slice %221 {offsets = [0, 24], sizes = [1, 8], strides = [1, 1]} : vector<1x32xf32> to vector<1x8xf32>
      %223 = arith.index_cast %arg9 : i32 to index
      %c0_86 = arith.constant 0 : index
      %224 = vector.load %arg8[%223, %c0_86] : memref<24x8xf32, #tpu.memory_space<vmem>>, vector<1x8xf32>
      tpu.vector_store %arg8[%223, %c0_86], %222 {strides = array<i32>} : memref<24x8xf32, #tpu.memory_space<vmem>>, vector<1x8xf32>,
    }
    %c24_i32_55 = arith.constant 24 : i32
    %c0_56 = arith.constant 0 : index
    %c0_57 = arith.constant 0 : index
    %159 = vector.load %arg8[%c0_56, %c0_57] : memref<24x8xf32, #tpu.memory_space<vmem>>, vector<24x8xf32>
    %c0_58 = arith.constant 0 : index
    %c0_59 = arith.constant 0 : index
    %160 = vector.load %arg5[%c0_58, %c0_59] : memref<24x32xf32, #tpu.memory_space<vmem>>, vector<24x32xf32>
    %c200 = arith.constant 200 : index
    %c0_60 = arith.constant 0 : index
    %161 = vector.load %arg6[%c200, %c0_60] : memref<264x128xf32, #tpu.memory_space<vmem>>, vector<32x8xf32>
    %cst_61 = arith.constant dense<0.000000e+00> : vector<24x8xf32>
    %162 = tpu.matmul %160, %161, %cst_61 {dimension_numbers = #tpu.dot_dimension_numbers<[1], [0], [0], [1], [0, 0, 1, 1], [], []>} : vector<24x32xf32>, vector<32x8xf32>, vector<24x8xf32> -> vector<24x8xf32>
    %c254 = arith.constant 254 : index
    %c0_62 = arith.constant 0 : index
    %163 = vector.load %arg6[%c254, %c0_62] : memref<264x128xf32, #tpu.memory_space<vmem>>, vector<1x8xf32>
    %164 = vector.broadcast %163 : vector<1x8xf32> to vector<24x8xf32>
    %165 = arith.addf %162, %164 : vector<24x8xf32>
    %166 = arith.addf %159, %165 : vector<24x8xf32>
    %cst_63 = arith.constant 0.000000e+00 : f32
    %167 = vector.broadcast %cst_63 : f32 to vector<24x8xf32>
    %168 = arith.maximumf %166, %167 : vector<24x8xf32>
    %169 = tpu.iota {dimensions = array<i32: 0>} : vector<12x24xi32>
    %c0_64 = arith.constant 0 : index
    %c0_65 = arith.constant 0 : index
    %170 = vector.load %arg4[%c0_64, %c0_65] : memref<1x24xi32, #tpu.memory_space<vmem>>, vector<1x24xi32>
    %171 = vector.broadcast %170 : vector<1x24xi32> to vector<12x24xi32>
    %172 = arith.cmpi eq, %169, %171 : vector<12x24xi32>
    %cst_66 = arith.constant 1.000000e+00 : f32
    %cst_67 = arith.constant 0.000000e+00 : f32
    %173 = vector.broadcast %cst_66 : f32 to vector<12x24xf32>
    %174 = vector.broadcast %cst_67 : f32 to vector<12x24xf32>
    %175 = arith.select %172, %173, %174 : vector<12x24xi1>, vector<12x24xf32>
    %cst_68 = arith.constant dense<0.000000e+00> : vector<12x8xf32>
    %176 = tpu.matmul %175, %168, %cst_68 {dimension_numbers = #tpu.dot_dimension_numbers<[1], [0], [0], [1], [0, 0, 1, 1], [], []>} : vector<12x24xf32>, vector<24x8xf32>, vector<12x8xf32> -> vector<12x8xf32>
    %177 = arith.addf %2, %176 : vector<12x8xf32>
    %c232 = arith.constant 232 : index
    %c0_69 = arith.constant 0 : index
    %178 = vector.load %arg6[%c232, %c0_69] : memref<264x128xf32, #tpu.memory_space<vmem>>, vector<8x8xf32>
    %cst_70 = arith.constant dense<0.000000e+00> : vector<12x8xf32>
    %179 = tpu.matmul %177, %178, %cst_70 {dimension_numbers = #tpu.dot_dimension_numbers<[1], [0], [0], [1], [0, 0, 1, 1], [], []>} : vector<12x8xf32>, vector<8x8xf32>, vector<12x8xf32> -> vector<12x8xf32>
    %c255 = arith.constant 255 : index
    %c0_71 = arith.constant 0 : index
    %180 = vector.load %arg6[%c255, %c0_71] : memref<264x128xf32, #tpu.memory_space<vmem>>, vector<1x8xf32>
    %181 = vector.broadcast %180 : vector<1x8xf32> to vector<12x8xf32>
    %182 = arith.addf %179, %181 : vector<12x8xf32>
    %cst_72 = arith.constant 0.000000e+00 : f32
    %183 = vector.broadcast %cst_72 : f32 to vector<12x8xf32>
    %184 = arith.maximumf %182, %183 : vector<12x8xf32>
    %c240 = arith.constant 240 : index
    %c0_73 = arith.constant 0 : index
    %185 = vector.load %arg6[%c240, %c0_73] : memref<264x128xf32, #tpu.memory_space<vmem>>, vector<8x8xf32>
    %cst_74 = arith.constant dense<0.000000e+00> : vector<12x8xf32>
    %186 = tpu.matmul %184, %185, %cst_74 {dimension_numbers = #tpu.dot_dimension_numbers<[1], [0], [0], [1], [0, 0, 1, 1], [], []>} : vector<12x8xf32>, vector<8x8xf32>, vector<12x8xf32> -> vector<12x8xf32>
    %c256 = arith.constant 256 : index
    %c0_75 = arith.constant 0 : index
    %187 = vector.load %arg6[%c256, %c0_75] : memref<264x128xf32, #tpu.memory_space<vmem>>, vector<1x8xf32>
    %188 = vector.broadcast %187 : vector<1x8xf32> to vector<12x8xf32>
    %189 = arith.addf %186, %188 : vector<12x8xf32>
    %cst_76 = arith.constant 0.000000e+00 : f32
    %190 = vector.broadcast %cst_76 : f32 to vector<12x8xf32>
    %191 = arith.maximumf %189, %190 : vector<12x8xf32>
    %c261 = arith.constant 261 : index
    %c0_77 = arith.constant 0 : index
    %192 = vector.load %arg6[%c261, %c0_77] : memref<264x128xf32, #tpu.memory_space<vmem>>, vector<2x8xf32>
    %193 = vector.extract_strided_slice %192 {offsets = [0, 0], sizes = [1, 8], strides = [1, 1]} : vector<2x8xf32> to vector<1x8xf32>
    %194 = vector.extract_strided_slice %192 {offsets = [1, 0], sizes = [1, 8], strides = [1, 1]} : vector<2x8xf32> to vector<1x8xf32>
    %cst_78 = arith.constant dense<0.000000e+00> : vector<8xf32>
    %195 = vector.multi_reduction <add>, %191, %cst_78 [0] : vector<12x8xf32> to vector<8xf32>
    %196 = vector.shape_cast %195 : vector<8xf32> to vector<1x8xf32>
    %cst_79 = arith.constant 0.0833333358 : f32
    %197 = vector.broadcast %cst_79 : f32 to vector<1x8xf32>
    %198 = arith.mulf %196, %197 : vector<1x8xf32>
    %199 = vector.broadcast %198 : vector<1x8xf32> to vector<12x8xf32>
    %200 = arith.subf %191, %199 : vector<12x8xf32>
    %201 = arith.mulf %200, %200 : vector<12x8xf32>
    %cst_80 = arith.constant dense<0.000000e+00> : vector<8xf32>
    %202 = vector.multi_reduction <add>, %201, %cst_80 [0] : vector<12x8xf32> to vector<8xf32>
    %203 = vector.shape_cast %202 : vector<8xf32> to vector<1x8xf32>
    %cst_81 = arith.constant 0.0833333358 : f32
    %204 = vector.broadcast %cst_81 : f32 to vector<1x8xf32>
    %205 = arith.mulf %203, %204 : vector<1x8xf32>
    %cst_82 = arith.constant 9.99999974E-6 : f32
    %206 = vector.broadcast %cst_82 : f32 to vector<1x8xf32>
    %207 = arith.addf %205, %206 : vector<1x8xf32>
    %208 = math.rsqrt %207 : vector<1x8xf32>
    %209 = vector.broadcast %208 : vector<1x8xf32> to vector<12x8xf32>
    %210 = arith.mulf %200, %209 : vector<12x8xf32>
    %211 = vector.broadcast %193 : vector<1x8xf32> to vector<12x8xf32>
    %212 = arith.mulf %210, %211 : vector<12x8xf32>
    %213 = vector.broadcast %194 : vector<1x8xf32> to vector<12x8xf32>
    %214 = arith.addf %212, %213 : vector<12x8xf32>
    %215 = arith.addf %2, %214 : vector<12x8xf32>
    %216 = tpu.concatenate %157, %215 in 1 : vector<12x24xf32>, vector<12x8xf32> -> vector<12x32xf32>
    %c0_83 = arith.constant 0 : index
    %c0_84 = arith.constant 0 : index
    %217 = vector.load %arg7[%c0_83, %c0_84] : memref<12x32xf32, #tpu.memory_space<vmem>>, vector<12x32xf32>
    tpu.vector_store %arg7[%c0_83, %c0_84], %216 {strides = array<i32>} : memref<12x32xf32, #tpu.memory_space<vmem>>, vector<12x32xf32>,
    return
  }
}

</mosaic_0001>

<bundles_post_ra>
// kernel: gps_wlpe_forward.1
= control target key start
LH: loop header
LB: loop body
LE: loop exit
PB: predicated region body
PF: predicated region fallthrough
CT: control target
= control target key end

     0   :  { %12 = vsyncpa [#allocation6], 0  ;;  %s2968_s0 = inlined_call_operand.vmem [shape: f32[12,32], index: 0, kind: input, shape index: {}]   ;;  %s2969_s1 = inlined_call_operand.vmem [shape: s32[12,1], index: 1, kind: input, shape index: {}]   ;;  %s2970_s2 = inlined_call_operand.vmem [shape: s32[1,12], index: 2, kind: input, shape index: {}]   ;;  %s2971_s3 = inlined_call_operand.vmem [shape: s32[24], index: 3, kind: input, shape index: {}]   ;;  %s2972_s4 = inlined_call_operand.vmem [shape: s32[1,24], index: 4, kind: input, shape index: {}]   ;;  %s2973_s5 = inlined_call_operand.vmem [shape: f32[24,32], index: 5, kind: input, shape index: {}]   ;;  %s2974_s6 = inlined_call_operand.hbm [shape: f32[264,128], index: 6, kind: input, shape index: {}]   ;;  %s2975_s7 = inlined_call_operand.hbm [shape: f32[12,32], index: 7, kind: output, shape index: {}]  }
   0x1   :  { %13 = vsyncpa [#allocation4], 0 }
   0x2   :  { %14 = vsyncpa [#allocation5], 0  ;;  %s27_s26 = sshll.u32 %s2971_s3, 4  ;;  %s28_s26 = int_to_ptr.vmem [resolvable:$true] %s27_s26 }
   0x3   :  { %s2564_s27 = scalar_lea.vmem %s28_s26, 16  ;;  %p2569_p1 = scmp.lt.s32.totalorder %s28_s26, %s28_s26 }
   0x4   :  { %p2565_p0 = scmp.ne.s32.totalorder %s28_s26, %s2564_s27  ;;  %p2570_p2 = scmp.lt.s32.totalorder %s2564_s27, %s2564_s27 }
   0x6   :  { %p2571_p3 = por %p2570_p2, %p2569_p1 }
   0x8   :  { %p2572_p4 = pnand %p2571_p3, %p2565_p0 }
   0xa   :  { %2575 = shalt.err (!%p2572_p4)
}
   0xb   :  { %s2634_s28 = smov [#allocation3]   ;;  %s2635_s29 = smov [#allocation7]  }
   0xc   :  { %30 = dma.vmem_to_smem %s28_s26, 16, %s2634_s28, [#allocation6]  }
   0xd   :  { %s40_s30 = sshll.u32 %s2635_s29, 4  ;;  %s2576_s10 = scalar_lea.hbm %s2974_s6, 4224  ;;  %s41_s30 = int_to_ptr.vmem [resolvable:$true] %s40_s30 }
   0xe   :  { %p2577_p5 = scmp.ne.s32.totalorder %s2974_s6, %s2576_s10  ;;  %p2580_p6 = scmp.lt.u32.totalorder %s2576_s10, %s2974_s6 }
  0x10   :  { %p2582_p7 = pnand %p2580_p6, %p2577_p5 }
  0x12   :  { %2585 = shalt.err (!%p2582_p7)
}
  0x13   :  { %s2586_s14 = scalar_lea.vmem %s41_s30, 4224  ;;  %p2591_p9 = scmp.lt.s32.totalorder %s41_s30, %s41_s30 }
  0x14   :  { %p2587_p8 = scmp.ne.s32.totalorder %s41_s30, %s2586_s14  ;;  %p2592_p10 = scmp.lt.s32.totalorder %s2586_s14, %s2586_s14 }
  0x16   :  { %p2593_p11 = por %p2592_p10, %p2591_p9 }
  0x18   :  { %p2594_p12 = pnand %p2593_p11, %p2587_p8 }
  0x1a   :  { %2597 = shalt.err (!%p2594_p12)
}
  0x1b   :  { %s2636_s15 = smov 128   ;;  %s2637_s16 = smov 8  }
  0x1c   :  { %46 = dma.hbm_to_vmem [thread:$0]  %s2974_s6, 4224, %s41_s30, [#allocation4], %s2636_s15, %s2636_s15, %s2637_s16  }
  0x1d   :  { %2624 = dma.done.wait [#allocation6], 16  }
  0x1e   :  { %2625 = vsyncadd [#allocation6], 4294967280 }
  0x1f   :  { %2626 = dma.done.wait [#allocation4], 4224  }
  0x20   :  { %2627 = vsyncadd [#allocation4], 4294963072 }
  0x21   :  { %53 = sfence }
  0x22   :  { %v56_v0 = vld [vmem:[#allocation7] sm:$0xff]  ;;  %v57_v1 = vld [vmem:[#allocation7 + $0x8] sm:$0xff]  ;;  %v58_v2 = vld [vmem:[#allocation7 + $0x10] sm:$0xff]  ;;  %vm65_vm0 = vcmask 261120   ;;  %vm170_vm1 = vcmask 64512   ;;  %s2638_s22 = smov 120  }
  0x23   :  { %v2345_v3 = vpack.c.bf16 %v57_v1, %v56_v0  ;;  %v59_v4 = vld [vmem:[#allocation7 + $0x18] sm:$0xff]  ;;  %v2720_v5 = vld [vmem:[%s2968_s0] sm:$0xff]  ;;  %v2727_v7 = vld [vmem:[%s2968_s0 + $0x8] sm:$0xf]  ;;  %s2639_s23 = smov 96   ;;  %s2640_s24 = smov 88  }
  0x24   :  { %v2349_v6 = vpack.c.bf16 %v59_v4, %v58_v2  ;;  %2193 = vmatprep.mubr.msk.f32.mxu0 %vm65_vm0, %v2720_v5  ;;  %v2038_v8 = vld [vmem:[#allocation7 + $0xf8] ss:$0 sm:$0xff]  ;;  %v148_v14 = vld [vmem:[%s2969_s1 + $0x8] sm:$0xf]  ;;  %v147_v15 = vld [vmem:[%s2969_s1] sm:$0xff]  ;;  %v2641_v16 = vmov 0  }
  0x25   :  { %2346 = vmatprep.subr.bf16.mxu0 %v2345_v3  ;;  %2495 = vset.pattern.permute.xlu1 %v2641_v16  ;;  %vm2753_vm2 = vmpackc.low %vm170_vm1, %vm170_vm1  ;;  %v2041_v28 = vld [vmem:[%s2970_s2] ss:$0 sm:$0xff]  ;;  %v2642_v31 = vmov -1e+30   ;;  %vm258_vm5 = vcmask 93184   ;;  %vm254_vm6 = vcmask 97280  }
  0x26   :  { %2348 = vmatpush3.bf16.msra.mxu0 %v2345_v3  ;;  %2494 = vset.pattern.permute.xlu0 %v2641_v16  ;;  %s2643_s2 = smov 56   ;;  %s2644_s30 = smov 80   ;;  %vm289_vm7 = vcmask 1043456   ;;  %vm2647_vm8 = vmmov 1   ;;  %vm996_vm10 = vcmask 130048   ;;  %vm999_vm11 = vcmask 195584  }
  0x27   :  { %2350 = vmatprep.subr.bf16.mxu0 %v2349_v6  ;;  %s2645_s8 = smov 64   ;;  %s2646_s9 = smov 112   ;;  %vm2794_vm9 = vmpackc.low %vm289_vm7, %vm2647_vm8  ;;  %vm1278_vm12 = vcmask 191488   ;;  %vm1420_vm13 = vcmask 392192  }
  0x28   :  { %s2648_s10 = smov 48   ;;  %s2649_s11 = smov 104  }
  0x29   :  { %s2650_s12 = smov 72   ;;  %s2651_s3 = smov 40  }
  0x2a   :  { %2352 = vmatpush3.bf16.msra.mxu0 %v2349_v6  ;;  %s2652_s13 = smov 16   ;;  %s2653_s14 = smov 24  }
  0x2b   :  { %s2630_s17 = smov 0  }
  0x2d   :  { %2194 = vmatmul.mubr.msk.f32.vlgmr.msra.gmra.mrb[0].mxu0 %vm65_vm0, %v2727_v7 }
 0x100   :  { %v2195_v9 = vpop.f32.mrb[0].mxu0 }
 0x101   :  { %v2731_v10 = vadd.f32 %v2195_v9, %v2038_v8  ;;  %v138_v11 = vpop.f32.mrb[1].mxu0 }
 0x102   :  { %v2733_v12 = vadd.f32 %v2038_v8, %v138_v11 }
 0x104   :  { %367 = vrot.lane.b32.xlu1 %v2733_v12, %s2638_s22  ;;  %2200 = vmatprep.mubr.msk.f32.mxu1 %vm170_vm1, %v2733_v12  ;;  %v2740_v13 = vpack.i.bf16 %v2731_v10, %v2733_v12 }
 0x106   :  { %2485 = vrot.lane.b32.xlu0 %v2740_v13, %s2639_s23 }
 0x108   :  { %369 = vrot.lane.b32.xlu1 %v2731_v10, %s2638_s22 }
 0x10a   :  { %2490 = vrot.lane.b32.xlu0 %v2740_v13, %s2640_s24 }
 0x10c   :  { %154 = vperm.xlu1 %2495, %v148_v14  }
 0x10e   :  { %151 = vperm.xlu0 %2494, %v147_v15  }
 0x176   :  { %v368_v26 = vpop.permute.xlu1 %367 }
 0x178   :  { %v2486_v17 = vpop.permute.xlu0 %2485 }
 0x179   :  { %v2488_v18 = vunpack.i.h.bf16 %v2486_v17  ;;  %v2487_v19 = vunpack.i.l.bf16 %v2486_v17 }
 0x17a   :  { %v370_v27 = vpop.permute.xlu1 %369 }
 0x17b   :  { %v2353_v21 = vpack.c.bf16 %v2488_v18, %v2487_v19 }
 0x17c   :  { %v2491_v22 = vpop.permute.xlu0 %2490 }
 0x17d   :  { %v2493_v23 = vunpack.i.h.bf16 %v2491_v22  ;;  %v2492_v24 = vunpack.i.l.bf16 %v2491_v22  ;;  %2355 = vmatprep.subr.msk.bf16.mxu1 %vm2753_vm2, %v2353_v21 }
 0x17e   :  { %2358 = vmatpush3.bf16.xpose.msk.msra.mxu1 %vm2753_vm2, %v2353_v21 }
 0x17f   :  { %v2365_v25 = vpack.c.bf16 %v2493_v23, %v2492_v24 }
 0x181   :  { %2367 = vmatprep.subr.msk.bf16.mxu1 %vm2753_vm2, %v2365_v25 }
 0x185   :  { %2201 = vmatmul.mubr.msk.f32.vlgmr.msra.gmra.mrb[0].mxu1 %vm170_vm1, %v2731_v10 }
 0x186   :  { %2370 = vmatpush3.bf16.xpose.msk.msra.mxu1 %vm2753_vm2, %v2365_v25  ;;  %2214 = vmatprep.mubr.msk.f32.mxu1 %vm170_vm1, %v368_v26 }
 0x18b   :  { %v155_v29 = vpop.permute.xlu1 %154 }
 0x18c   :  { %vm161_vm3 = vcmp.eq.s32.totalorder %v155_v29, %v2041_v28 }
 0x18d   :  { %2215 = vmatmul.mubr.msk.f32.vlgmr.msra.gmra.mrb[2].mxu1 %vm170_vm1, %v370_v27  ;;  %v152_v30 = vpop.permute.xlu0 %151  ;;  %v2772_v32 = vsel %vm161_vm3, 0.0, %v2642_v31 }
 0x18e   :  { %vm160_vm4 = vcmp.eq.s32.totalorder %v152_v30, %v2041_v28 }
 0x18f   :  { %v2774_v33 = vsel %vm160_vm4, 0.0, %v2642_v31 }
 0x258   :  { %v2202_v34 = vpop.f32.mrb[0].mxu1 }
 0x259   :  { %v251_v35 = vadd.f32 %v2202_v34, %v2772_v32  ;;  %v245_v36 = vpop.f32.mrb[1].mxu1 }
 0x25a   :  { %v246_v37 = vadd.f32 %v245_v36, %v2774_v33 }
 0x25b   :  { %v259_v38 = vsel %vm258_vm5, %v251_v35, -inf }
 0x25c   :  { %260 = vmax.xlane.f32.xlu0 %v259_v38  ;;  %v255_v39 = vsel %vm254_vm6, %v246_v37, -inf }
 0x25d   :  { %256 = vmax.xlane.f32.xlu1 %v255_v39 }
 0x260   :  { %v2216_v40 = vpop.f32.mrb[2].mxu1 }
 0x261   :  { %v455_v41 = vadd.f32 %v2216_v40, %v2772_v32  ;;  %v449_v42 = vpop.f32.mrb[3].mxu1 }
 0x262   :  { %v450_v43 = vadd.f32 %v449_v42, %v2774_v33 }
 0x263   :  { %v461_v44 = vsel %vm258_vm5, %v455_v41, -inf }
 0x264   :  { %462 = vmax.xlane.f32.xlu1 %v461_v44  ;;  %v458_v45 = vsel %vm254_vm6, %v450_v43, -inf }
 0x265   :  { %459 = vmax.xlane.f32.xlu0 %v458_v45 }
 0x2e9   :  { %v261_v46 = vpop.xlane.xlu0 %260 }
 0x2ea   :  { %v263_v47 = vsub.f32 %v251_v35, %v261_v46  ;;  %v257_v48 = vpop.xlane.xlu1 %256 }
 0x2eb   :  { %v262_v49 = vsub.f32 %v246_v37, %v257_v48 }
 0x2ec   :  { %v266_v50 = vmul.f32 1.442695, %v263_v47 }
 0x2ed   :  { %v264_v51 = vmul.f32 1.442695, %v262_v49 }
 0x2ee   :  { %2526 = vpow2.f32 %v266_v50 }
 0x2ef   :  { %2528 = vpow2.f32 %v264_v51 }
 0x2f1   :  { %v463_v52 = vpop.xlane.xlu1 %462 }
 0x2f2   :  { %v465_v53 = vsub.f32 %v455_v41, %v463_v52  ;;  %v460_v54 = vpop.xlane.xlu0 %459 }
 0x2f3   :  { %v464_v55 = vsub.f32 %v450_v43, %v460_v54 }
 0x2f4   :  { %v468_v56 = vmul.f32 1.442695, %v465_v53 }
 0x2f5   :  { %v466_v57 = vmul.f32 1.442695, %v464_v55 }
 0x2f6   :  { %2530 = vpow2.f32 %v468_v56 }
 0x2f7   :  { %2532 = vpow2.f32 %v466_v57 }
 0x2f8   :  { %v2527_v58 = vpop.eup %2526 }
 0x2f9   :  { %v2529_v59 = vpop.eup %2528  ;;  %v271_v60 = vsel %vm258_vm5, %v2527_v58, 0.0 }
 0x2fa   :  { %272 = vadd.xlane.f32.xlu1 %v271_v60  ;;  %v268_v61 = vsel %vm254_vm6, %v2529_v59, 0.0 }
 0x2fb   :  { %269 = vadd.xlane.f32.xlu0 %v268_v61 }
 0x300   :  { %v2531_v62 = vpop.eup %2530 }
 0x301   :  { %v2533_v63 = vpop.eup %2532  ;;  %v473_v0 = vsel %vm258_vm5, %v2531_v62, 0.0 }
 0x302   :  { %474 = vadd.xlane.f32.xlu1 %v473_v0  ;;  %v470_v1 = vsel %vm254_vm6, %v2533_v63, 0.0 }
 0x303   :  { %471 = vadd.xlane.f32.xlu0 %v470_v1 }
 0x313   :  { %2502 = vrot.lane.b32.xlu1 %v2740_v13, %s2643_s2 }
 0x317   :  { %2507 = vrot.lane.b32.xlu1 %v2740_v13, %s2644_s30 }
 0x319   :  { %2497 = vrot.lane.b32.xlu0 %v2740_v13, %s2645_s8 }
 0x31b   :  { %570 = vrot.lane.b32.xlu1 %v2731_v10, %s2646_s9 }
 0x31d   :  { %568 = vrot.lane.b32.xlu0 %v2733_v12, %s2646_s9 }
 0x387   :  { %v273_v3 = vpop.xlane.xlu1 %272 }
 0x388   :  { %v270_v2 = vpop.xlane.xlu0 %269 }
 0x389   :  { %2534 = vrcp.f32 %v270_v2 }
 0x38a   :  { %2536 = vrcp.f32 %v273_v3 }
 0x38f   :  { %v475_v4 = vpop.xlane.xlu1 %474 }
 0x390   :  { %v472_v6 = vpop.xlane.xlu0 %471 }
 0x391   :  { %2538 = vrcp.f32 %v472_v6 }
 0x392   :  { %2540 = vrcp.f32 %v475_v4 }
 0x393   :  { %v2535_v8 = vpop.eup %2534  ;;  %v2503_v9 = vpop.permute.xlu1 %2502 }
 0x394   :  { %v2498_v11 = vpop.permute.xlu0 %2497  ;;  %v276_v14 = vmul.f32 %v2535_v8, %v2529_v59  ;;  %v2505_v15 = vunpack.i.h.bf16 %v2503_v9  ;;  %v2504_v16 = vunpack.i.l.bf16 %v2503_v9  ;;  %v2537_v23 = vpop.eup %2536 }
 0x395   :  { %v2500_v17 = vunpack.i.h.bf16 %v2498_v11  ;;  %v2499_v18 = vunpack.i.l.bf16 %v2498_v11  ;;  %v277_v28 = vmul.f32 %v2537_v23, %v2527_v58 }
 0x396   :  { %2207 = vmatprep.mubr.msk.f32.mxu0 %vm254_vm6, %v276_v14  ;;  %v2371_v24 = vpack.c.bf16 %v2505_v15, %v2504_v16 }
 0x397   :  { %v2359_v21 = vpack.c.bf16 %v2500_v17, %v2499_v18  ;;  %v2508_v22 = vpop.permute.xlu1 %2507 }
 0x398   :  { %v2510_v25 = vunpack.i.h.bf16 %v2508_v22  ;;  %v2509_v26 = vunpack.i.l.bf16 %v2508_v22  ;;  %v569_v35 = vpop.permute.xlu0 %568 }
 0x399   :  { %2361 = vmatprep.subr.msk.bf16.mxu0 %vm2794_vm9, %v2359_v21 }
 0x39a   :  { %2364 = vmatpush3.bf16.msk.msra.mxu0 %vm2794_vm9, %v2359_v21  ;;  %v2377_v31 = vpack.c.bf16 %v2510_v25, %v2509_v26 }
 0x39b   :  { %v2539_v27 = vpop.eup %2538  ;;  %2373 = vmatprep.subr.msk.bf16.mxu0 %vm2794_vm9, %v2371_v24  ;;  %v571_v36 = vpop.permute.xlu1 %570 }
 0x39c   :  { %v2541_v29 = vpop.eup %2540  ;;  %v478_v30 = vmul.f32 %v2539_v27, %v2533_v63 }
 0x39d   :  { %2208 = vmatmul.mubr.msk.f32.vlgmr.msra.gmra.mrb[2].mxu0 %vm254_vm6, %v277_v28  ;;  %v479_v34 = vmul.f32 %v2541_v29, %v2531_v62 }
 0x39e   :  { %2376 = vmatpush3.bf16.msk.msra.mxu0 %vm2794_vm9, %v2371_v24  ;;  %2221 = vmatprep.mubr.msk.f32.mxu0 %vm254_vm6, %v478_v30 }
 0x39f   :  { %2379 = vmatprep.subr.msk.bf16.mxu0 %vm2753_vm2, %v2377_v31 }
 0x3a1   :  { %2222 = vmatmul.mubr.msk.f32.vlgmr.msra.gmra.mrb[4].mxu0 %vm254_vm6, %v479_v34 }
 0x3a2   :  { %2228 = vmatprep.mubr.msk.f32.mxu0 %vm170_vm1, %v569_v35 }
 0x3a7   :  { %2382 = vmatpush3.bf16.xpose.msk.msra.mxu0 %vm2753_vm2, %v2377_v31 }
 0x3ae   :  { %2229 = vmatmul.mubr.msk.f32.vlgmr.msra.gmra.mrb[6].mxu0 %vm170_vm1, %v571_v36 }
 0x470   :  { %v2815_v37 = vpop.f32.mrb[2].mxu0 }
 0x471   :  { %v2817_v38 = vpop.f32.mrb[3].mxu0 }
 0x474   :  { %v2819_v39 = vpop.f32.mrb[4].mxu0 }
 0x475   :  { %v2821_v40 = vpop.f32.mrb[5].mxu0 }
 0x481   :  { %v2230_v41 = vpop.f32.mrb[6].mxu0 }
 0x482   :  { %v656_v42 = vadd.f32 %v2230_v41, %v2772_v32  ;;  %v650_v43 = vpop.f32.mrb[7].mxu0 }
 0x483   :  { %v651_v44 = vadd.f32 %v650_v43, %v2774_v33  ;;  %v1003_v43 = vld [vmem:[#allocation7 + $0x28] sm:$0xff] }
 0x484   :  { %v662_v45 = vsel %vm258_vm5, %v656_v42, -inf }
 0x485   :  { %663 = vmax.xlane.f32.xlu1 %v662_v45  ;;  %v659_v46 = vsel %vm254_vm6, %v651_v44, -inf }
 0x486   :  { %660 = vmax.xlane.f32.xlu0 %v659_v46  ;;  %v1005_v46 = vld [vmem:[#allocation7 + $0x38] sm:$0xff] }
 0x496   :  { %2512 = vrot.lane.b32.xlu1 %v2740_v13, %s2648_s10 }
 0x49a   :  { %769 = vrot.lane.b32.xlu1 %v2733_v12, %s2649_s11 }
 0x49e   :  { %771 = vrot.lane.b32.xlu1 %v2731_v10, %s2649_s11 }
 0x512   :  { %v664_v47 = vpop.xlane.xlu1 %663 }
 0x513   :  { %v666_v48 = vsub.f32 %v656_v42, %v664_v47  ;;  %v661_v49 = vpop.xlane.xlu0 %660  ;;  %v1002_v42 = vld [vmem:[#allocation7 + $0x20] sm:$0xff] }
 0x514   :  { %v665_v50 = vsub.f32 %v651_v44, %v661_v49  ;;  %v1004_v44 = vld [vmem:[#allocation7 + $0x30] sm:$0xff]  ;;  %v2401_v45 = vpack.c.bf16 %v1003_v43, %v1002_v42 }
 0x515   :  { %v669_v51 = vmul.f32 1.442695, %v666_v48  ;;  %v2405_v47 = vpack.c.bf16 %v1005_v46, %v1004_v44  ;;  %v1093_v48 = vld [vmem:[#allocation7 + $0x48] sm:$0xff] }
 0x516   :  { %v667_v52 = vmul.f32 1.442695, %v665_v50  ;;  %v2513_v53 = vpop.permute.xlu1 %2512 }
 0x517   :  { %2542 = vpow2.f32 %v669_v51  ;;  %v2515_v54 = vunpack.i.h.bf16 %v2513_v53  ;;  %v2514_v55 = vunpack.i.l.bf16 %v2513_v53 }
 0x518   :  { %2544 = vpow2.f32 %v667_v52 }
 0x519   :  { %v2383_v56 = vpack.c.bf16 %v2515_v54, %v2514_v55 }
 0x51a   :  { %v770_v6 = vpop.permute.xlu1 %769 }
 0x51b   :  { %2385 = vmatprep.subr.msk.bf16.mxu1 %vm2794_vm9, %v2383_v56 }
 0x51c   :  { %2388 = vmatpush3.bf16.msk.msra.mxu1 %vm2794_vm9, %v2383_v56 }
 0x51e   :  { %v772_v8 = vpop.permute.xlu1 %771 }
 0x521   :  { %v2543_v12 = vpop.eup %2542 }
 0x522   :  { %v674_v10 = vsel %vm258_vm5, %v2543_v12, 0.0  ;;  %v2545_v57 = vpop.eup %2544 }
 0x523   :  { %675 = vadd.xlane.f32.xlu0 %v674_v10  ;;  %v671_v58 = vsel %vm254_vm6, %v2545_v57, 0.0 }
 0x527   :  { %672 = vadd.xlane.f32.xlu0 %v671_v58 }
 0x53d   :  { %2517 = vrot.lane.b32.xlu0 %v2740_v13, %s2650_s12 }
 0x5b0   :  { %v676_v59 = vpop.xlane.xlu0 %675 }
 0x5b1   :  { %2546 = vrcp.f32 %v676_v59 }
 0x5b4   :  { %v673_v60 = vpop.xlane.xlu0 %672 }
 0x5b5   :  { %2548 = vrcp.f32 %v673_v60 }
 0x5b8   :  { %v2518_v61 = vpop.permute.xlu0 %2517 }
 0x5b9   :  { %v2520_v62 = vunpack.i.h.bf16 %v2518_v61  ;;  %v2519_v63 = vunpack.i.l.bf16 %v2518_v61 }
 0x5bb   :  { %v2389_v0 = vpack.c.bf16 %v2520_v62, %v2519_v63  ;;  %v2547_v1 = vpop.eup %2546  ;;  %v1094_v62 = vld [vmem:[#allocation7 + $0x50] sm:$0xff]  ;;  %v1095_v63 = vld [vmem:[#allocation7 + $0x58] sm:$0xff] }
 0x5bc   :  { %v680_v4 = vmul.f32 %v2547_v1, %v2543_v12  ;;  %v1185_v1 = vld [vmem:[#allocation7 + $0x68] sm:$0xff] }
 0x5bd   :  { %2391 = vmatprep.subr.msk.bf16.mxu1 %vm2753_vm2, %v2389_v0 }
 0x5bf   :  { %v2549_v2 = vpop.eup %2548 }
 0x5c0   :  { %v679_v3 = vmul.f32 %v2549_v2, %v2545_v57 }
 0x5c2   :  { %2235 = vmatprep.mubr.msk.f32.mxu1 %vm254_vm6, %v679_v3 }
 0x5c3   :  { %2236 = vmatmul.mubr.msk.f32.vlgmr.msra.gmra.mrb[4].mxu1 %vm254_vm6, %v680_v4 }
 0x5c4   :  { %2394 = vmatpush3.bf16.xpose.msk.msra.mxu1 %vm2753_vm2, %v2389_v0  ;;  %2242 = vmatprep.mubr.msk.f32.mxu1 %vm170_vm1, %v770_v6  ;;  %v1184_v0 = vld [vmem:[#allocation7 + $0x60] sm:$0xff] }
 0x5c5   :  { %v2417_v2 = vpack.c.bf16 %v1185_v1, %v1184_v0 }
 0x5cb   :  { %2243 = vmatmul.mubr.msk.f32.vlgmr.msra.gmra.mrb[6].mxu1 %vm170_vm1, %v772_v8 }
 0x696   :  { %v2237_v9 = vpop.f32.mrb[4].mxu1 }
 0x697   :  { %v760_v11 = vpop.f32.mrb[5].mxu1 }
 0x69e   :  { %v2244_v14 = vpop.f32.mrb[6].mxu1 }
 0x69f   :  { %v857_v15 = vadd.f32 %v2244_v14, %v2772_v32  ;;  %v851_v16 = vpop.f32.mrb[7].mxu1 }
 0x6a0   :  { %v852_v17 = vadd.f32 %v851_v16, %v2774_v33 }
 0x6a1   :  { %v863_v18 = vsel %vm258_vm5, %v857_v15, -inf }
 0x6a2   :  { %864 = vmax.xlane.f32.xlu1 %v863_v18  ;;  %v860_v21 = vsel %vm254_vm6, %v852_v17, -inf }
 0x6a3   :  { %861 = vmax.xlane.f32.xlu0 %v860_v21 }
 0x6b3   :  { %2522 = vrot.lane.b32.xlu1 %v2740_v13, %s2651_s3 }
 0x6b7   :  { %974 = vrot.lane.b32.xlu1 %v2819_v39, %s2637_s16 }
 0x6bb   :  { %980 = vrot.lane.b32.xlu1 %v760_v11, %s2652_s13  ;;  %v1187_v11 = vld [vmem:[#allocation7 + $0x78] sm:$0xff] }
 0x72f   :  { %v865_v20 = vpop.xlane.xlu1 %864 }
 0x730   :  { %v867_v22 = vsub.f32 %v857_v15, %v865_v20  ;;  %v862_v32 = vpop.xlane.xlu0 %861  ;;  %v2073_v15 = vld [vmem:[#allocation7 + $0xfa] ss:$0 sm:$0xff] }
 0x731   :  { %v866_v23 = vsub.f32 %v852_v17, %v862_v32  ;;  %v1318_v32 = vld [vmem:[#allocation7 + $0x80] sm:$0xff] }
 0x732   :  { %v870_v24 = vmul.f32 1.442695, %v867_v22 }
 0x733   :  { %v868_v33 = vmul.f32 1.442695, %v866_v23  ;;  %v2523_v25 = vpop.permute.xlu1 %2522  ;;  %v1319_v23 = vld [vmem:[#allocation7 + $0x88] sm:$0xff] }
 0x734   :  { %v2525_v26 = vunpack.i.h.bf16 %v2523_v25  ;;  %v2524_v27 = vunpack.i.l.bf16 %v2523_v25  ;;  %v1409_v25 = vld [vmem:[#allocation7 + $0x98] sm:$0xff] }
 0x735   :  { %2550 = vpow2.f32 %v868_v33  ;;  %v1320_v33 = vld [vmem:[#allocation7 + $0x90] sm:$0xff] }
 0x736   :  { %v2395_v28 = vpack.c.bf16 %v2525_v26, %v2524_v27  ;;  %2552 = vpow2.f32 %v870_v24  ;;  %v2425_v24 = vpack.c.bf16 %v1319_v23, %v1318_v32  ;;  %v1410_v26 = vld [vmem:[#allocation7 + $0xa0] sm:$0xff] }
 0x737   :  { %v975_v53 = vpop.permute.xlu1 %974  ;;  %v2429_v27 = vpack.c.bf16 %v1410_v26, %v1409_v25  ;;  %v2082_v25 = vld [vmem:[#allocation7 + $0xfd] ss:$0 sm:$0xff] }
 0x738   :  { %2397 = vmatprep.subr.msk.bf16.mxu0 %vm2794_vm9, %v2395_v28  ;;  %v995_v10 = vsel %vm170_vm1, %v2815_v37, %v975_v53  ;;  %v2070_v37 = vld [vmem:[#allocation7 + $0xf9] ss:$0 sm:$0xff] }
 0x739   :  { %2400 = vmatpush3.bf16.msk.msra.mxu0 %vm2794_vm9, %v2395_v28  ;;  %v2076_v28 = vld [vmem:[#allocation7 + $0xfb] ss:$0 sm:$0xff] }
 0x73a   :  { %2402 = vmatprep.subr.bf16.mxu0 %v2401_v45 }
 0x73b   :  { %v981_v55 = vpop.permute.xlu1 %980 }
 0x73f   :  { %v2551_v13 = vpop.eup %2550 }
 0x740   :  { %v872_v29 = vsel %vm254_vm6, %v2551_v13, 0.0  ;;  %v2553_v30 = vpop.eup %2552 }
 0x741   :  { %873 = vadd.xlane.f32.xlu0 %v872_v29  ;;  %v875_v31 = vsel %vm258_vm5, %v2553_v30, 0.0 }
 0x745   :  { %876 = vadd.xlane.f32.xlu0 %v875_v31 }
 0x75b   :  { %972 = vrot.lane.b32.xlu0 %v2821_v40, %s2637_s16  ;;  %v1092_v40 = vld [vmem:[#allocation7 + $0x40] sm:$0xff] }
 0x75c   :  { %v2409_v49 = vpack.c.bf16 %v1093_v48, %v1092_v40 }
 0x75e   :  { %2410 = vmatprep.subr.bf16.mxu1 %v2409_v49 }
 0x75f   :  { %982 = vrot.lane.b32.xlu0 %v2237_v9, %s2652_s13  ;;  %2412 = vmatpush3.bf16.msra.mxu1 %v2409_v49  ;;  %v1186_v9 = vld [vmem:[#allocation7 + $0x70] sm:$0xff] }
 0x760   :  { %v2421_v14 = vpack.c.bf16 %v1187_v11, %v1186_v9  ;;  %v1412_v9 = vld [vmem:[#allocation7 + $0xb0] sm:$0xff] }
 0x7ce   :  { %v874_v34 = vpop.xlane.xlu0 %873 }
 0x7cf   :  { %2554 = vrcp.f32 %v874_v34 }
 0x7d2   :  { %v877_v35 = vpop.xlane.xlu0 %876 }
 0x7d3   :  { %2556 = vrcp.f32 %v877_v35 }
 0x7d6   :  { %v973_v52 = vpop.permute.xlu0 %972 }
 0x7d7   :  { %v994_v56 = vsel %vm170_vm1, %v2817_v38, %v973_v52  ;;  %v2413_v38 = vpack.c.bf16 %v1095_v63, %v1094_v62  ;;  %v1276_v63 = vld [vmem:[#allocation7 + $0x101] sm:$0x3] }
 0x7d8   :  { %v997_v58 = vsel %vm996_vm10, %v994_v56, %v981_v55 }
 0x7d9   :  { %v2555_v36 = vpop.eup %2554  ;;  %2414 = vmatprep.subr.bf16.mxu1 %v2413_v38 }
 0x7da   :  { %v880_v39 = vmul.f32 %v2555_v36, %v2551_v13  ;;  %v983_v54 = vpop.permute.xlu0 %982  ;;  %2416 = vmatpush3.bf16.msra.mxu1 %v2413_v38 }
 0x7db   :  { %v998_v59 = vsel %vm996_vm10, %v995_v10, %v983_v54  ;;  %2426 = vmatprep.subr.bf16.mxu1 %v2425_v24 }
 0x7dc   :  { %2249 = vmatprep.mubr.msk.f32.mxu0 %vm254_vm6, %v880_v39 }
 0x7dd   :  { %v2557_v19 = vpop.eup %2556 }
 0x7de   :  { %v881_v41 = vmul.f32 %v2557_v19, %v2553_v30 }
 0x7e0   :  { %2250 = vmatmul.mubr.msk.f32.vlgmr.msra.gmra.mrb[8].mxu0 %vm254_vm6, %v881_v41 }
 0x7e1   :  { %2404 = vmatpush3.bf16.msra.mxu0 %v2401_v45 }
 0x7e2   :  { %2406 = vmatprep.subr.bf16.mxu0 %v2405_v47 }
 0x7e5   :  { %2408 = vmatpush3.bf16.msra.mxu0 %v2405_v47 }
 0x7e6   :  { %2418 = vmatprep.subr.bf16.mxu0 %v2417_v2 }
 0x8b3   :  { %v2251_v50 = vpop.f32.mrb[8].mxu0 }
 0x8b4   :  { %990 = vrot.lane.b32.xlu0 %v2251_v50, %s2653_s14  ;;  %v961_v51 = vpop.f32.mrb[9].mxu0 }
 0x8b5   :  { %988 = vrot.lane.b32.xlu1 %v961_v51, %s2653_s14 }
 0x926   :  { %v991_v12 = vpop.permute.xlu0 %990 }
 0x927   :  { %v989_v57 = vpop.permute.xlu1 %988  ;;  %v1001_v61 = vsel %vm999_vm11, %v998_v59, %v991_v12  ;;  %v1306_v59 = vlaneseq }
 0x928   :  { %v1000_v60 = vsel %vm999_vm11, %v997_v58, %v989_v57 }
 0x929   :  { %2260 = vmatprep.mubr.msk.f32.mxu0 %vm65_vm0, %v1000_v60 }
 0x92a   :  { %2261 = vmatmul.mubr.msk.f32.vlgmr.msra.gmra.mrb[10].mxu0 %vm65_vm0, %v1001_v61  ;;  %v2884_v61 = vshrl.u32 %v1306_v59, 7 }
 0x92b   :  { %2420 = vmatpush3.bf16.msra.mxu0 %v2417_v2 }
 0x92c   :  { %2422 = vmatprep.subr.bf16.mxu0 %v2421_v14  ;;  %v2887_v62 = vsub.s32 0, %v2884_v61  ;;  %v2890_v38 = vsub.s32 1, %v2884_v61 }
 0x92e   :  { %v1309_v0 = vrot.slane %v1276_v63, %v2887_v62 }
 0x92f   :  { %2424 = vmatpush3.bf16.msra.mxu0 %v2421_v14 }
 0x9fd   :  { %v2262_v3 = vpop.f32.mrb[10].mxu0 }
 0x9fe   :  { %v1083_v4 = vpop.f32.mrb[11].mxu0  ;;  %v1089_v8 = vadd.f32 %v2262_v3, %v2070_v37  ;;  %v1315_v3 = vrot.slane %v1276_v63, %v2890_v38 }
 0x9ff   :  { %v1084_v6 = vadd.f32 %v2070_v37, %v1083_v4 }
 0xa01   :  { %2271 = vmatprep.mubr.msk.f32.mxu1 %vm65_vm0, %v1084_v6 }
 0xa02   :  { %2272 = vmatmul.mubr.msk.f32.vlgmr.msra.gmra.mrb[8].mxu1 %vm65_vm0, %v1089_v8  ;;  %v1411_v8 = vld [vmem:[#allocation7 + $0xa8] sm:$0xff] }
 0xa03   :  { %2428 = vmatpush3.bf16.msra.mxu1 %v2425_v24 }
 0xa04   :  { %2289 = vmatprep.subr.mxu1 %v1320_v33 }
 0xa07   :  { %2290 = vmatpush3.msra.mxu1 %v1320_v33 }
 0xa08   :  { %2430 = vmatprep.subr.bf16.mxu1 %v2429_v27 }
 0xad5   :  { %v2273_v16 = vpop.f32.mrb[8].mxu1 }
 0xad6   :  { %v1179_v17 = vadd.f32 %v2273_v16, %v2073_v15  ;;  %v1173_v18 = vpop.f32.mrb[9].mxu1  ;;  %v1413_v16 = vld [vmem:[#allocation7 + $0xb8] sm:$0xff] }
 0xad7   :  { %v1174_v21 = vadd.f32 %v2073_v15, %v1173_v18  ;;  %v2433_v15 = vpack.c.bf16 %v1412_v9, %v1411_v8 }
 0xad8   :  { %v1183_v22 = vmax.f32 %v1179_v17, 0.0  ;;  %v1414_v17 = vld [vmem:[#allocation7 + $0xc0] sm:$0xff] }
 0xad9   :  { %v1182_v20 = vmax.f32 %v1174_v21, 0.0  ;;  %v2437_v18 = vpack.c.bf16 %v1414_v17, %v1413_v16  ;;  %v2079_v21 = vld [vmem:[#allocation7 + $0xfc] ss:$0 sm:$0xff] }
 0xadb   :  { %2282 = vmatprep.mubr.msk.f32.mxu0 %vm65_vm0, %v1182_v20 }
 0xadc   :  { %2283 = vmatmul.mubr.msk.f32.vlgmr.msra.gmra.mrb[12].mxu0 %vm65_vm0, %v1183_v22 }
 0xbaf   :  { %v2284_v13 = vpop.f32.mrb[12].mxu0 }
 0xbb0   :  { %v1271_v29 = vadd.f32 %v2284_v13, %v2076_v28  ;;  %v1265_v30 = vpop.f32.mrb[13].mxu0 }
 0xbb1   :  { %v1266_v31 = vadd.f32 %v2076_v28, %v1265_v30 }
 0xbb2   :  { %v1275_v34 = vadd.f32 %v1271_v29, %v2727_v7 }
 0xbb3   :  { %v1274_v35 = vadd.f32 %v1266_v31, %v2720_v5 }
 0xbb4   :  { %v1279_v36 = vsel %vm1278_vm12, %v1275_v34, 0.0 }
 0xbb5   :  { %v1277_v39 = vsel %vm999_vm11, %v1274_v35, 0.0 }
 0xbb6   :  { %v1280_v19 = vadd.f32 %v1279_v36, %v1277_v39 }
 0xbb8   :  { %v1281_v41 = vrot.slane %v1280_v19, 4 }
 0xbba   :  { %v1282_v42 = vadd.f32 %v1281_v41, %v1280_v19 }
 0xbbc   :  { %v1283_v43 = vrot.slane %v1282_v42, 2 }
 0xbbe   :  { %v1284_v44 = vadd.f32 %v1283_v43, %v1282_v42 }
 0xbc0   :  { %v1285_v45 = vrot.slane %v1284_v44, 1 }
 0xbc2   :  { %v1286_v46 = vadd.f32 %v1285_v45, %v1284_v44 }
 0xbc4   :  { %v1287_v47 = vmul.f32 0.083333336, %v1286_v46 }
 0xbc6   :  { %v1288_v40 = vsub.f32 %v1274_v35, %v1287_v47  ;;  %v1289_v48 = vsub.f32 %v1275_v34, %v1287_v47 }
 0xbc8   :  { %v1290_v49 = vmul.f32 %v1288_v40, %v1288_v40  ;;  %v1291_v50 = vmul.f32 %v1289_v48, %v1289_v48 }
 0xbca   :  { %v1292_v51 = vsel %vm999_vm11, %v1290_v49, 0.0  ;;  %v1293_v52 = vsel %vm1278_vm12, %v1291_v50, 0.0 }
 0xbcb   :  { %v1294_v53 = vadd.f32 %v1293_v52, %v1292_v51 }
 0xbcd   :  { %v1295_v54 = vrot.slane %v1294_v53, 4 }
 0xbcf   :  { %v1296_v55 = vadd.f32 %v1295_v54, %v1294_v53 }
 0xbd1   :  { %v1297_v56 = vrot.slane %v1296_v55, 2 }
 0xbd3   :  { %v1298_v12 = vadd.f32 %v1297_v56, %v1296_v55 }
 0xbd5   :  { %v1299_v10 = vrot.slane %v1298_v12, 1 }
 0xbd7   :  { %v1300_v57 = vadd.f32 %v1299_v10, %v1298_v12 }
 0xbd9   :  { %v1301_v58 = vmul.f32 0.083333336, %v1300_v57  ;;  %v1504_v57 = vld [vmem:[#allocation7 + $0x103] sm:$0x3] }
 0xbdb   :  { %v1302_v60 = vadd.f32 1e-05, %v1301_v58  ;;  %v1536_v58 = vrot.slane %v1504_v57, %v2887_v62 }
 0xbdd   :  { %2558 = vrsqrt.f32 %v1302_v60 }
 0xbe7   :  { %v2559_v1 = vpop.eup %2558 }
 0xbe8   :  { %v1304_v2 = vmul.f32 %v2559_v1, %v1288_v40  ;;  %v1305_v37 = vmul.f32 %v2559_v1, %v1289_v48 }
 0xbea   :  { %v1310_v4 = vmul.f32 %v1309_v0, %v1304_v2  ;;  %v1311_v6 = vmul.f32 %v1309_v0, %v1305_v37  ;;  %v1542_v0 = vrot.slane %v1504_v57, %v2890_v38 }
 0xbec   :  { %v1316_v11 = vadd.f32 %v1315_v3, %v1310_v4  ;;  %v1317_v14 = vadd.f32 %v1315_v3, %v1311_v6 }
 0xbee   :  { %2291 = vmatprep.mubr.msk.f32.mxu1 %vm999_vm11, %v1316_v11 }
 0xbef   :  { %2292 = vmatmul.mubr.msk.f32.vlgmr.msra.gmra.mrb[10].mxu1 %vm999_vm11, %v1317_v14 }
 0xbf0   :  { %2432 = vmatpush3.bf16.msra.mxu1 %v2429_v27 }
 0xbf1   :  { %2434 = vmatprep.subr.bf16.mxu1 %v2433_v15 }
 0xbf4   :  { %2436 = vmatpush3.bf16.msra.mxu1 %v2433_v15 }
 0xbf5   :  { %2438 = vmatprep.subr.bf16.mxu1 %v2437_v18 }
 0xbf8   :  { %2440 = vmatpush3.bf16.msra.mxu1 %v2437_v18 }
 0xcc2   :  { %v2293_v20 = vpop.f32.mrb[10].mxu1 }
 0xcc3   :  { %v1404_v22 = vadd.f32 %v2293_v20, %v2079_v21  ;;  %v1398_v32 = vpop.f32.mrb[11].mxu1 }
 0xcc4   :  { %v1399_v23 = vadd.f32 %v2079_v21, %v1398_v32 }
 0xcc5   :  { %v1408_v33 = vmax.f32 %v1404_v22, 0.0 }
 0xcc6   :  { %v1407_v24 = vmax.f32 %v1399_v23, 0.0 }
 0xcc8   :  { %2306 = vmatprep.mubr.msk.f32.mxu1 %vm1420_vm13, %v1407_v24 }
 0xcc9   :  { %2307 = vmatmul.mubr.msk.f32.vlgmr.msra.gmra.mrb[12].mxu1 %vm1420_vm13, %v1408_v33 }
 0xd9c   :  { %v2308_v26 = vpop.f32.mrb[12].mxu1 }
 0xd9d   :  { %v1499_v27 = vadd.f32 %v2308_v26, %v2082_v25  ;;  %v1493_v28 = vpop.f32.mrb[13].mxu1 }
 0xd9e   :  { %v1494_v13 = vadd.f32 %v2082_v25, %v1493_v28 }
 0xd9f   :  { %v1503_v29 = vadd.f32 %v1499_v27, %v1317_v14 }
 0xda0   :  { %v1502_v30 = vadd.f32 %v1494_v13, %v1316_v11 }
 0xda1   :  { %v1506_v31 = vsel %vm1278_vm12, %v1503_v29, 0.0 }
 0xda2   :  { %v1505_v34 = vsel %vm999_vm11, %v1502_v30, 0.0 }
 0xda3   :  { %v1507_v35 = vadd.f32 %v1506_v31, %v1505_v34 }
 0xda5   :  { %v1508_v36 = vrot.slane %v1507_v35, 4 }
 0xda7   :  { %v1509_v39 = vadd.f32 %v1508_v36, %v1507_v35 }
 0xda9   :  { %v1510_v19 = vrot.slane %v1509_v39, 2 }
 0xdab   :  { %v1511_v41 = vadd.f32 %v1510_v19, %v1509_v39 }
 0xdad   :  { %v1512_v42 = vrot.slane %v1511_v41, 1 }
 0xdaf   :  { %v1513_v43 = vadd.f32 %v1512_v42, %v1511_v41 }
 0xdb1   :  { %v1514_v44 = vmul.f32 0.083333336, %v1513_v43 }
 0xdb3   :  { %v1515_v45 = vsub.f32 %v1502_v30, %v1514_v44  ;;  %v1516_v46 = vsub.f32 %v1503_v29, %v1514_v44 }
 0xdb5   :  { %v1517_v47 = vmul.f32 %v1515_v45, %v1515_v45  ;;  %v1518_v40 = vmul.f32 %v1516_v46, %v1516_v46 }
 0xdb7   :  { %v1519_v48 = vsel %vm999_vm11, %v1517_v47, 0.0  ;;  %v1520_v49 = vsel %vm1278_vm12, %v1518_v40, 0.0 }
 0xdb8   :  { %v1521_v50 = vadd.f32 %v1520_v49, %v1519_v48 }
 0xdba   :  { %v1522_v51 = vrot.slane %v1521_v50, 4 }
 0xdbc   :  { %v1523_v52 = vadd.f32 %v1522_v51, %v1521_v50 }
 0xdbe   :  { %v1524_v53 = vrot.slane %v1523_v52, 2 }
 0xdc0   :  { %v1525_v54 = vadd.f32 %v1524_v53, %v1523_v52 }
 0xdc2   :  { %v1526_v55 = vrot.slane %v1525_v54, 1 }
 0xdc4   :  { %v1527_v56 = vadd.f32 %v1526_v55, %v1525_v54 }
 0xdc6   :  { %v1528_v12 = vmul.f32 0.083333336, %v1527_v56 }
 0xdc8   :  { %v1529_v10 = vadd.f32 1e-05, %v1528_v12 }
 0xdca   :  { %2560 = vrsqrt.f32 %v1529_v10 }
 0xdd4   :  { %v2561_v59 = vpop.eup %2560 }
 0xdd5   :  { %v1531_v60 = vmul.f32 %v2561_v59, %v1515_v45  ;;  %v1532_v63 = vmul.f32 %v2561_v59, %v1516_v46 }
 0xdd7   :  { %v1537_v1 = vmul.f32 %v1536_v58, %v1531_v60  ;;  %v1538_v2 = vmul.f32 %v1536_v58, %v1532_v63 }
 0xdd9   :  { %v2902_v37 = vadd.f32 %v1542_v0, %v1537_v1  ;;  %v2904_v3 = vadd.f32 %v1542_v0, %v1538_v2 }
 0xdda LB: > { %s1551_s18 = sld [smem:[#allocation3 + %s2632_s17]]  ;;  %s2654_s21 = smov 104   ;;  %vm1559_vm14 = vcmask 57344   ;;  %s2632_s17 = sphi %s2630_s17, %s1550_s17  }
 0xddb   : > { %s1558_s22 = scalar_lea.vmem [#allocation2], %s2632_s17  ;;  %s1550_s17 = sadd.s32 1, %s2632_s17  }
 0xddc   : > { %p1547_p13 = scmp.ge.s32.totalorder %s1550_s17, 24  }
 0xddd   :  { %v1567_v8 = vld [vmem:[#allocation7 + $0xc8] sm:$0xff] (%p1547_p13)  ;;  %v1568_v9 = vld [vmem:[#allocation7 + $0xd0] sm:$0xff] (%p1547_p13)  ;;  %v1569_v11 = vld [vmem:[#allocation7 + $0xd8] sm:$0xff] (%p1547_p13)  ;;  %v2655_v14 = vmov (%p1547_p13), 0.0|0.0   ;;  %vm2656_vm15 = vmmov (%p1547_p13), 0   ;;  %v2657_v17 = vmov (%p1547_p13), 0.0  }
 0xdde   :  { %2441 = vmatprep.subr.bf16.mxu0 (%p1547_p13), %v2655_v14  ;;  %v2442_v15 = vpack.c.bf16 (%p1547_p13), %v1568_v9, %v1567_v8  ;;  %v1570_v16 = vld [vmem:[#allocation7 + $0xe0] sm:$0xff] (%p1547_p13)  ;;  %2317 = vmatprep.mubr.msk.f32.mxu0 (%p1547_p13), %vm2656_vm15, %v2657_v17  ;;  %v1564_v21 = vld [vmem:[%s2973_s5] sm:$0xff] (%p1547_p13)  ;;  %v1565_v20 = vld [vmem:[%s2973_s5 + $0x8] sm:$0xff] (%p1547_p13)  ;;  %v1673_v43 = vadd.s32 (%p1547_p13), 8, %v2884_v61  ;;  %vm1958_vm4 = vcmask (%p1547_p13), 60416  }
 0xddf   :  { %v2445_v18 = vpack.c.bf16 (%p1547_p13), %v1570_v16, %v1569_v11  ;;  %v1566_v22 = vld [vmem:[%s2973_s5 + $0x10] sm:$0xff] (%p1547_p13)  ;;  %v2089_v32 = vld [vmem:[%s2972_s4] ss:$0 sm:$0xff] (%p1547_p13)  ;;  %v1867_v55 = vld [vmem:[#allocation7 + $0xf0] sm:$0xff] (%p1547_p13)  ;;  %s2658_s4 = smov (%p1547_p13), [#allocation8]  }
 0xde0   : > { %s1552_s6 = scalar_lea.vmem %s2968_s0, %s1551_s18  ;;  %2443 = vmatpush3.bf16.msra.mxu0 (%p1547_p13), %v2442_v15  ;;  %vm1679_vm2 = vcmp.eq.s32.totalorder (%p1547_p13), %v2884_v61, %v2089_v32  ;;  %v2085_v24 = vld [vmem:[#allocation7 + $0xfe] ss:$0 sm:$0xff] (%p1547_p13)  ;;  %vm1680_vm3 = vcmp.eq.s32.totalorder (%p1547_p13), %v1673_v43, %v2089_v32  ;;  %v1774_v40 = vld [vmem:[#allocation7 + $0xe8] sm:$0xff] (%p1547_p13)  ;;  %v2092_v56 = vld [vmem:[#allocation7 + $0xff] ss:$0 sm:$0xff] (%p1547_p13)  ;;  %s2018_s5 = sshll.u32 (%p1547_p13), %s2658_s4, 4  ;;  %s2019_s5 = int_to_ptr.vmem [resolvable:$true] %s2018_s5 }
 0xde1   : > { %v1553_v4 = vld [vmem:[%s1552_s6] sm:$0x1]  ;;  %2444 = vmatprep.subr.bf16.mxu0 (%p1547_p13), %v2655_v14  ;;  %v1681_v23 = vsel (%p1547_p13), %vm1679_vm2, 1.0, %v2657_v17  ;;  %v1682_v47 = vsel (%p1547_p13), %vm1680_vm3, 1.0, %v2657_v17  ;;  %v2095_v63 = vld [vmem:[#allocation7 + $0x100] ss:$0 sm:$0xff] (%p1547_p13)  ;;  %p2603_p1 = scmp.lt.s32.totalorder (%p1547_p13), %s2019_s5, %s2019_s5 }
 0xde2   : > { %1555 = vrot.lane.b32.xlu0 %v1553_v4, %s2654_s21  ;;  %2332 = vmatprep.mubr.msk.f32.mxu1 (%p1547_p13), %vm999_vm11, %v1681_v23  ;;  %s2598_s29 = scalar_lea.vmem (%p1547_p13), %s2019_s5, 256 }
 0xde3   :  { %p2599_p0 = scmp.ne.s32.totalorder (%p1547_p13), %s2019_s5, %s2598_s29  ;;  %p2604_p2 = scmp.lt.s32.totalorder (%p1547_p13), %s2598_s29, %s2598_s29 }
 0xde4   :  { %2446 = vmatpush3.bf16.msra.mxu0 (%p1547_p13), %v2445_v18 }
 0xde5   :  { %2335 = vmatprep.subr.mxu0 (%p1547_p13), %v1774_v40  ;;  %p2605_p3 = por (%p1547_p13), %p2604_p2, %p2603_p1 }
 0xde7   :  { %2318 = vmatmul.mubr.msk.f32.vlgmr.msra.gmra.mrb[14].mxu0 (%p1547_p13), %vm65_vm0, %v1564_v21  ;;  %p2606_p4 = pnand (%p1547_p13), %p2605_p3, %p2599_p0 }
 0xde8   :  { %2320 = vmatprep.mubr.msk.f32.mxu0 (%p1547_p13), %vm2656_vm15, %v2657_v17  ;;  %2336 = vmatpush3.msra.mxu0 (%p1547_p13), %v1774_v40 }
 0xdeb   :  { %2321 = vmatmul.mubr.msk.f32.gmra.mrb[16].mxu0 (%p1547_p13), %vm65_vm0, %v1565_v20 }
 0xdec   :  { %2323 = vmatprep.mubr.msk.f32.mxu0 (%p1547_p13), %vm2656_vm15, %v2657_v17 }
 0xdef   :  { %2324 = vmatmul.mubr.msk.f32.gmra.mrb[18].mxu0 (%p1547_p13), %vm65_vm0, %v1566_v22 }
 0xe4f   :  { %1549 = sbr.rel (!%p1547_p13) target bundleno = 3546 (0xdda), region = 65 }
 0xe54   : > { %v1556_v6 = vpop.permute.xlu0 %1555 }
 0xe55   : > { %1560 = vst.msk [vmem:[%s1558_s22] sm:$0x1] %vm1559_vm14, %v1556_v6 }
 0xe5c   :  { %v1561_v27 = vld [vmem:[#allocation2] sm:$0xff]  ;;  %v1562_v28 = vld [vmem:[#allocation2 + $0x8] sm:$0xff]  ;;  %v1563_v35 = vld [vmem:[#allocation2 + $0x10] sm:$0xff] }
 0xeba   :  { %v1651_v33 = vpop.f32.mrb[14].mxu0 }
 0xebb   :  { %v1652_v25 = vadd.f32 %v2085_v24, %v1651_v33  ;;  %v2319_v26 = vpop.f32.mrb[15].mxu0 }
 0xebd   :  { %v1665_v29 = vadd.f32 %v1652_v25, %v1561_v27 }
 0xebe   :  { %v1656_v13 = vpop.f32.mrb[16].mxu0 }
 0xebf   :  { %v1657_v30 = vadd.f32 %v2085_v24, %v1656_v13  ;;  %v2322_v31 = vpop.f32.mrb[17].mxu0  ;;  %v1668_v39 = vmax.f32 %v1665_v29, 0.0 }
 0xec1   :  { %v1666_v34 = vadd.f32 %v1657_v30, %v1562_v28 }
 0xec2   :  { %v1661_v36 = vpop.f32.mrb[18].mxu0 }
 0xec3   :  { %v1669_v19 = vmax.f32 %v1666_v34, 0.0  ;;  %v1662_v41 = vadd.f32 %v2085_v24, %v1661_v36  ;;  %v2325_v42 = vpop.f32.mrb[19].mxu0 }
 0xec5   :  { %v1667_v44 = vadd.f32 %v1662_v41, %v1563_v35  ;;  %v2447_v45 = vpack.c.bf16 %v1669_v19, %v1668_v39  ;;  %v1956_v39 = vld [vmem:[#allocation7 + $0x105] sm:$0x3] }
 0xec6   :  { %v1989_v19 = vrot.slane %v1956_v39, %v2887_v62 }
 0xec7   :  { %v1670_v46 = vmax.f32 %v1667_v44, 0.0  ;;  %2448 = vmatprep.subr.bf16.mxu1 %v2447_v45  ;;  %v1995_v44 = vrot.slane %v1956_v39, %v2890_v38 }
 0xec8   :  { %2450 = vmatpush3.bf16.msra.mxu1 %v2447_v45 }
 0xec9   :  { %2330 = vmatprep.subr.mxu1 %v1670_v46 }
 0xecc   :  { %2331 = vmatpush3.msra.mxu1 %v1670_v46 }
 0xecd   :  { %2333 = vmatmul.mubr.msk.f32.vlgmr.msra.gmra.mrb[14].mxu1 %vm999_vm11, %v1682_v47  ;;  %2340 = vmatprep.subr.mxu1 %v1867_v55 }
 0xece   :  { %2341 = vmatpush3.msra.mxu1 %v1867_v55 }
 0xfa0   :  { %v2334_v48 = vpop.f32.mrb[14].mxu1 }
 0xfa1   :  { %v1755_v49 = vpop.f32.mrb[15].mxu1 }
 0xfa2   :  { %1766 = vrot.lane.b32.xlu0 %v1755_v49, %s2653_s14 }
 0xfa6   :  { %1768 = vrot.lane.b32.xlu0 %v2334_v48, %s2653_s14 }
0x1014   :  { %v1767_v61 = vpop.permute.xlu0 %1766 }
0x1015   :  { %v1772_v50 = vadd.f32 %v1767_v61, %v2720_v5 }
0x1017   :  { %1782 = vrot.lane.b32.xlu1 %v1772_v50, %s2649_s11 }
0x1018   :  { %v1769_v51 = vpop.permute.xlu0 %1768 }
0x1019   :  { %v1773_v52 = vadd.f32 %v1769_v51, %v2727_v7 }
0x101b   :  { %1784 = vrot.lane.b32.xlu1 %v1773_v52, %s2649_s11 }
0x1089   :  { %v1783_v53 = vpop.permute.xlu1 %1782 }
0x108a   :  { %2337 = vmatprep.mubr.msk.f32.mxu0 %vm170_vm1, %v1783_v53 }
0x108d   :  { %v1785_v54 = vpop.permute.xlu1 %1784 }
0x108e   :  { %2338 = vmatmul.mubr.msk.f32.vlgmr.msra.gmra.mrb[20].mxu0 %vm170_vm1, %v1785_v54 }
0x1161   :  { %v2339_v12 = vpop.f32.mrb[20].mxu0 }
0x1162   :  { %v1862_v10 = vadd.f32 %v2339_v12, %v2092_v56  ;;  %v1856_v57 = vpop.f32.mrb[21].mxu0 }
0x1163   :  { %v1857_v58 = vadd.f32 %v2092_v56, %v1856_v57 }
0x1164   :  { %v1866_v60 = vmax.f32 %v1862_v10, 0.0 }
0x1165   :  { %v1865_v59 = vmax.f32 %v1857_v58, 0.0 }
0x1167   :  { %2342 = vmatprep.mubr.msk.f32.mxu1 %vm170_vm1, %v1865_v59 }
0x1168   :  { %2343 = vmatmul.mubr.msk.f32.vlgmr.msra.gmra.mrb[16].mxu1 %vm170_vm1, %v1866_v60 }
0x123b   :  { %v2344_v0 = vpop.f32.mrb[16].mxu1 }
0x123c   :  { %v1951_v1 = vadd.f32 %v2344_v0, %v2095_v63  ;;  %v1945_v2 = vpop.f32.mrb[17].mxu1 }
0x123d   :  { %v1946_v4 = vadd.f32 %v2095_v63, %v1945_v2 }
0x123e   :  { %v1955_v6 = vmax.f32 %v1951_v1, 0.0 }
0x123f   :  { %v1954_v8 = vmax.f32 %v1946_v4, 0.0 }
0x1240   :  { %v1959_v9 = vsel %vm1958_vm4, %v1955_v6, 0.0 }
0x1241   :  { %v1957_v11 = vsel %vm170_vm1, %v1954_v8, 0.0 }
0x1242   :  { %v1960_v14 = vadd.f32 %v1959_v9, %v1957_v11 }
0x1244   :  { %v1961_v15 = vrot.slane %v1960_v14, 4 }
0x1246   :  { %v1962_v16 = vadd.f32 %v1961_v15, %v1960_v14 }
0x1248   :  { %v1963_v17 = vrot.slane %v1962_v16, 2 }
0x124a   :  { %v1964_v18 = vadd.f32 %v1963_v17, %v1962_v16 }
0x124c   :  { %v1965_v21 = vrot.slane %v1964_v18, 1 }
0x124e   :  { %v1966_v20 = vadd.f32 %v1965_v21, %v1964_v18 }
0x1250   :  { %v1967_v22 = vmul.f32 0.083333336, %v1966_v20 }
0x1252   :  { %v1968_v32 = vsub.f32 %v1954_v8, %v1967_v22  ;;  %v1969_v23 = vsub.f32 %v1955_v6, %v1967_v22 }
0x1254   :  { %v1970_v24 = vmul.f32 %v1968_v32, %v1968_v32  ;;  %v1971_v33 = vmul.f32 %v1969_v23, %v1969_v23 }
0x1256   :  { %v1972_v25 = vsel %vm170_vm1, %v1970_v24, 0.0  ;;  %v1973_v26 = vsel %vm1958_vm4, %v1971_v33, 0.0  ;;  %vm2011_vm1 = vcmask 257024  }
0x1257   :  { %v1974_v27 = vadd.f32 %v1973_v26, %v1972_v25 }
0x1259   :  { %v1975_v28 = vrot.slane %v1974_v27, 4 }
0x125b   :  { %v1976_v13 = vadd.f32 %v1975_v28, %v1974_v27 }
0x125d   :  { %v1977_v29 = vrot.slane %v1976_v13, 2 }
0x125f   :  { %v1978_v30 = vadd.f32 %v1977_v29, %v1976_v13 }
0x1261   :  { %v1979_v31 = vrot.slane %v1978_v30, 1 }
0x1263   :  { %v1980_v34 = vadd.f32 %v1979_v31, %v1978_v30 }
0x1265   :  { %v1981_v35 = vmul.f32 0.083333336, %v1980_v34 }
0x1267   :  { %v1982_v36 = vadd.f32 1e-05, %v1981_v35 }
0x1269   :  { %2562 = vrsqrt.f32 %v1982_v36 }
0x1273   :  { %v2563_v41 = vpop.eup %2562 }
0x1274   :  { %v1984_v42 = vmul.f32 %v2563_v41, %v1968_v32  ;;  %v1985_v43 = vmul.f32 %v2563_v41, %v1969_v23 }
0x1276   :  { %v1991_v45 = vmul.f32 %v1989_v19, %v1985_v43  ;;  %v1990_v46 = vmul.f32 %v1989_v19, %v1984_v42 }
0x1278   :  { %v1997_v47 = vadd.f32 %v1995_v44, %v1991_v45  ;;  %v1996_v40 = vadd.f32 %v1995_v44, %v1990_v46 }
0x127a   :  { %2002 = vrot.lane.b32.xlu1 %v1997_v47, %s2653_s14  ;;  %2000 = vrot.lane.b32.xlu0 %v1996_v40, %s2653_s14 }
0x12ec   :  { %v2003_v48 = vpop.permute.xlu1 %2002  ;;  %v2001_v49 = vpop.permute.xlu0 %2000 }
0x12ed   :  { %v2007_v62 = vadd.f32 %v2003_v48, %v2727_v7  ;;  %v2006_v61 = vadd.f32 %v2001_v49, %v2720_v5 }
0x12ef   :  { %v2009_v38 = vsel %vm999_vm11, %v2904_v3, %v2007_v62  ;;  %v2008_v50 = vsel %vm999_vm11, %v2902_v37, %v2006_v61 }
0x12f0   :  { %2012 = vst.msk [vmem:[#allocation8 + $0x8] sm:$0xf] %vm2011_vm1, %v2009_v38 }
0x12f1   :  { %2010 = vst.msk [vmem:[#allocation8] sm:$0xff] %vm65_vm0, %v2008_v50 }
0x12f2   :  { %2609 = shalt.err (!%p2606_p4)
}
0x12f3   :  { %s2610_s8 = scalar_lea.hbm %s2975_s7, 256 }
0x12f4   :  { %p2611_p5 = scmp.ne.s32.totalorder %s2975_s7, %s2610_s8  ;;  %p2614_p6 = scmp.lt.u32.totalorder %s2610_s8, %s2975_s7 }
0x12f6   :  { %p2616_p7 = pnand %p2614_p6, %p2611_p5 }
0x12f8   :  { %2619 = shalt.err (!%p2616_p7)
}
0x12f9   :  { %2024 = dma.vmem_to_hbm [thread:$0]  %s2019_s5, 256, %s2975_s7, [#allocation5], %s2636_s15, %s2636_s15, %s2637_s16  }
0x12fa   :  { %2628 = dma.done.wait [#allocation5], 256  }
0x12fb   :  { %2629 = vsyncadd [#allocation5], 4294967040 }
0x12fc   :  { %2028 = vsyncpa [#allocation4], 1 }
0x12fd   :  { %2029 = vsyncpa [#allocation5], 1 }
0x12fe   :  { %2030 = vsyncpa [#allocation6], 1 }

</bundles_post_ra>
